<compile_context>
chip_gen: v7x
topology: tpu7x:2x2x1
jax: 0.10.0
libtpu: 0.0.40
codegen_flags: <defaults>
</compile_context>

<pallas_src>
import functools

import jax
import jax.numpy as jnp
from jax.experimental import pallas as pl
from jax.experimental.pallas import tpu as pltpu

_LATENT_PAD = 128  # lane-dense width for the packed [mu | logvar] head


def _vae_kernel(x_ref, eps_ref,
                w_enc_ref, b_enc_ref,
                w_mulv_ref, b_mulv_ref,
                w_d1_ref, b_d1_ref,
                w_d2_ref, b_d2_ref,
                recon_ref, mulv_ref, *, latent):
    # ---- encoder: Linear(D_in, 256) + ReLU (bf16 MXU, fp32 accumulate) ----
    x = x_ref[...].astype(jnp.bfloat16)                                # [TB, D_in]
    h = jnp.dot(x, w_enc_ref[...], preferred_element_type=jnp.float32)
    h = jnp.maximum(h + b_enc_ref[...], 0.0)                           # [TB, 256] f32

    # ---- fused latent heads: one [256, 128] matmul (cols >=64 are zero) ----
    mulv = jnp.dot(h.astype(jnp.bfloat16), w_mulv_ref[...],
                   preferred_element_type=jnp.float32) + b_mulv_ref[...]  # [TB, 128]
    mu = mulv[:, :latent]
    logvar = mulv[:, latent:2 * latent]

    # ---- reparameterize: z = mu + eps * exp(0.5 * logvar) ----
    z = mu + eps_ref[...] * jnp.exp(0.5 * logvar)                      # [TB, L] f32

    # ---- decoder: Linear(L, 256) + ReLU, Linear(256, D_in) + Sigmoid ----
    h2 = jnp.dot(z.astype(jnp.bfloat16), w_d1_ref[...],
                 preferred_element_type=jnp.float32)
    h2 = jnp.maximum(h2 + b_d1_ref[...], 0.0)                          # [TB, 256] f32
    logits = jnp.dot(h2.astype(jnp.bfloat16), w_d2_ref[...],
                     preferred_element_type=jnp.float32) + b_d2_ref[...]
    recon = jax.nn.sigmoid(logits)                                     # [TB, D_in]

    recon_ref[...] = recon.astype(recon_ref.dtype)
    mulv_ref[...] = mulv.astype(mulv_ref.dtype)


def _round_up(x, m):
    return ((x + m - 1) // m) * m


def _vmem_budget_bytes(tb, d_in, latent, hidden):
    """Tight VMEM budget: double-buffered I/O tiles, small resident weights,
    in-kernel temporaries, 2 MiB slack.  Clamped to >= default scoped limit so
    a slightly-under estimate can never be tighter than the compiler default."""
    f32, bf16 = 4, 2
    w_bytes = bf16 * (d_in * hidden + hidden * _LATENT_PAD
                      + latent * hidden + hidden * d_in)
    b_bytes = f32 * (hidden + _LATENT_PAD + hidden + d_in)
    io_bytes = f32 * tb * (d_in + latent + d_in + _LATENT_PAD)   # x, eps, recon, mulv
    scratch = tb * (f32 * (2 * hidden + _LATENT_PAD + latent)
                    + bf16 * (d_in + 2 * hidden + latent))       # f32 + bf16 temporaries
    budget = 2 * (w_bytes + b_bytes + io_bytes) + scratch + (2 << 20)
    return max(budget, 32 << 20)


def prepare_params(p):
    """One-time weight preparation (hoisted out of the per-call path):
    bf16 weights, mu/logvar heads fused and zero-padded to 128 lanes."""
    d_in, hidden = p["w_enc"].shape
    latent = p["w_mu"].shape[1]
    w_mulv = jnp.zeros((hidden, _LATENT_PAD), jnp.bfloat16)
    w_mulv = w_mulv.at[:, :latent].set(p["w_mu"].astype(jnp.bfloat16))
    w_mulv = w_mulv.at[:, latent:2 * latent].set(p["w_lv"].astype(jnp.bfloat16))
    b_mulv = jnp.zeros((1, _LATENT_PAD), jnp.float32)
    b_mulv = b_mulv.at[:, :latent].set(p["b_mu"])
    b_mulv = b_mulv.at[:, latent:2 * latent].set(p["b_lv"])
    return dict(
        w_enc=p["w_enc"].astype(jnp.bfloat16), b_enc=p["b_enc"],
        w_mulv=w_mulv, b_mulv=b_mulv,
        w_d1=p["w_d1"].astype(jnp.bfloat16), b_d1=p["b_d1"],
        w_d2=p["w_d2"].astype(jnp.bfloat16), b_d2=p["b_d2"],
    )


@functools.partial(jax.jit, static_argnames=("tile_b",))
def vae_forward(x, eps, kp, *, tile_b=1024):
    """Full VAE forward in one Pallas call, batch-tiled along a parallel grid.

    `kp` must come from prepare_params().  Returns (recon, mu, logvar) in f32.
    """
    b, d_in = x.shape
    latent = eps.shape[1]

    # --- batch tiling: pad only to a multiple of 8, spread rows evenly ---
    b8 = _round_up(b, 8)
    g = max(1, -(-b8 // tile_b))
    if g % 2 == 1 and b8 > 512:
        g += 1                      # even (>=2) parallel grid -> both v7x TCs active
    tb = _round_up(-(-b8 // g), 8)
    b_pad = g * tb
    if b_pad != b:
        x = jnp.pad(x, ((0, b_pad - b), (0, 0)))
        eps = jnp.pad(eps, ((0, b_pad - b), (0, 0)))

    def row_spec(last_dim):
        return pl.BlockSpec((tb, last_dim), lambda i: (i, 0))

    def resident_spec(arr):
        # Full array, same block every grid step -> stays VMEM-resident.
        return pl.BlockSpec(arr.shape, lambda i: (0, 0))

    in_specs = [
        row_spec(d_in),                       # x
        row_spec(latent),                     # eps
        resident_spec(kp["w_enc"]), resident_spec(kp["b_enc"]),
        resident_spec(kp["w_mulv"]), resident_spec(kp["b_mulv"]),
        resident_spec(kp["w_d1"]), resident_spec(kp["b_d1"]),
        resident_spec(kp["w_d2"]), resident_spec(kp["b_d2"]),
    ]
    out_specs = (
        row_spec(d_in),                       # recon
        row_spec(_LATENT_PAD),                # packed [mu | logvar | zeros], lane-dense
    )
    out_shapes = (
        jax.ShapeDtypeStruct((b_pad, d_in), jnp.float32),
        jax.ShapeDtypeStruct((b_pad, _LATENT_PAD), jnp.float32),
    )

    recon, mulv = pl.pallas_call(
        functools.partial(_vae_kernel, latent=latent),
        grid=(g,),
        in_specs=in_specs,
        out_specs=out_specs,
        out_shape=out_shapes,
        compiler_params=pltpu.CompilerParams(
            dimension_semantics=("parallel",),
            vmem_limit_bytes=_vmem_budget_bytes(tb, d_in, latent, 256),
        ),
    )(x, eps,
      kp["w_enc"], kp["b_enc"],
      kp["w_mulv"], kp["b_mulv"],
      kp["w_d1"], kp["b_d1"],
      kp["w_d2"], kp["b_d2"])

    recon = recon[:b]
    mu = mulv[:b, :latent]
    logvar = mulv[:b, latent:2 * latent]
    return recon, mu, logvar


def init_params(key, input_dim, latent_dim, hidden=256):
    """Deterministic synthetic init (same shapes as the PyTorch module), fp32."""
    ks = jax.random.split(key, 10)

    def lin(kw, kb, fan_in, fan_out):
        # torch.nn.Linear default init: U(-1/sqrt(fan_in), 1/sqrt(fan_in))
        bound = 1.0 / jnp.sqrt(fan_in)
        w = jax.random.uniform(kw, (fan_in, fan_out), jnp.float32, -bound, bound)
        b = jax.random.uniform(kb, (1, fan_out), jnp.float32, -bound, bound)
        return w, b

    w_enc, b_enc = lin(ks[0], ks[1], input_dim, hidden)
    w_mu, b_mu = lin(ks[2], ks[3], hidden, latent_dim)
    w_lv, b_lv = lin(ks[4], ks[5], hidden, latent_dim)
    w_d1, b_d1 = lin(ks[6], ks[7], latent_dim, hidden)
    w_d2, b_d2 = lin(ks[8], ks[9], hidden, input_dim)

    return dict(w_enc=w_enc, b_enc=b_enc, w_mu=w_mu, b_mu=b_mu,
                w_lv=w_lv, b_lv=b_lv, w_d1=w_d1, b_d1=b_d1,
                w_d2=w_d2, b_d2=b_d2)


def vae_forward_ref(x, eps, p):
    """Pure-JAX fp32 reference for correctness checking (module semantics)."""
    h = jnp.maximum(x @ p["w_enc"] + p["b_enc"], 0.0)
    mu = h @ p["w_mu"] + p["b_mu"]
    logvar = h @ p["w_lv"] + p["b_lv"]
    z = mu + eps * jnp.exp(0.5 * logvar)
    h2 = jnp.maximum(z @ p["w_d1"] + p["b_d1"], 0.0)
    recon = jax.nn.sigmoid(h2 @ p["w_d2"] + p["b_d2"])
    return recon, mu, logvar


if __name__ == "__main__":
    key = jax.random.PRNGKey(0)
    k_param, k_x, k_eps = jax.random.split(key, 3)

    batch = 8
    input_dim = 768    # VariationalAutoEncoder.N_FEAT
    latent_dim = 32    # as used in _train(...)

    params = init_params(k_param, input_dim, latent_dim)
    kparams = prepare_params(params)           # hoisted: bf16 cast + head fusion once

    # bf16 MXU operands with f32 accumulation -> relaxed tolerances vs fp32 ref.
    ATOL = RTOL = 3e-2

    x = jax.random.uniform(k_x, (batch, input_dim), jnp.float32)   # flattened batch
    eps = jax.random.normal(k_eps, (batch, latent_dim), jnp.float32)

    recon, mu, logvar = vae_forward(x, eps, kparams)
    jax.block_until_ready((recon, mu, logvar))

    recon_r, mu_r, logvar_r = vae_forward_ref(x, eps, params)
    assert recon.shape == (batch, input_dim)
    assert mu.shape == (batch, latent_dim)
    assert logvar.shape == (batch, latent_dim)
    assert jnp.allclose(recon, recon_r, atol=ATOL, rtol=RTOL)
    assert jnp.allclose(mu, mu_r, atol=ATOL, rtol=RTOL)
    assert jnp.allclose(logvar, logvar_r, atol=ATOL, rtol=RTOL)

    # Also exercise the multi-tile path (grid > 1, uneven batch -> minimal pad).
    big_b = 1000
    kx2, ke2 = jax.random.split(jax.random.PRNGKey(1))
    x2 = jax.random.uniform(kx2, (big_b, input_dim), jnp.float32)
    eps2 = jax.random.normal(ke2, (big_b, latent_dim), jnp.float32)
    r2, m2, lv2 = vae_forward(x2, eps2, kparams)
    jax.block_until_ready((r2, m2, lv2))
    r2r, m2r, lv2r = vae_forward_ref(x2, eps2, params)
    assert jnp.allclose(r2, r2r, atol=ATOL, rtol=RTOL)
    assert jnp.allclose(m2, m2r, atol=ATOL, rtol=RTOL)
    assert jnp.allclose(lv2, lv2r, atol=ATOL, rtol=RTOL)

    print("KERNEL_OK")
</pallas_src>

<mosaic_0001>
module attributes {stable_mosaic.version = 11 : i64} {
  func.func @_vae_kernel(%arg0: i32, %arg1: memref<8x768xf32, #tpu.memory_space<vmem>>, %arg2: memref<8x32xf32, #tpu.memory_space<vmem>>, %arg3: memref<768x256xbf16, #tpu.memory_space<vmem>>, %arg4: memref<1x256xf32, #tpu.memory_space<vmem>>, %arg5: memref<256x128xbf16, #tpu.memory_space<vmem>>, %arg6: memref<1x128xf32, #tpu.memory_space<vmem>>, %arg7: memref<32x256xbf16, #tpu.memory_space<vmem>>, %arg8: memref<1x256xf32, #tpu.memory_space<vmem>>, %arg9: memref<256x768xbf16, #tpu.memory_space<vmem>>, %arg10: memref<1x768xf32, #tpu.memory_space<vmem>>, %arg11: memref<8x768xf32, #tpu.memory_space<vmem>>, %arg12: memref<8x128xf32, #tpu.memory_space<vmem>>) attributes {dimension_semantics = [#tpu.dimension_semantics<parallel>], iteration_bounds = array<i64: 1>, scalar_prefetch = 0 : i64, scratch_operands = 0 : i64, tpu.core_type = #tpu.core_type<tc>, window_params = [{transform_indices = @transform_0, window_bounds = array<i64: 8, 768>}, {transform_indices = @transform_1, window_bounds = array<i64: 8, 32>}, {pipeline_mode = #tpu.pipeline_mode<synchronous>, transform_indices = @transform_2, window_bounds = array<i64: 768, 256>}, {pipeline_mode = #tpu.pipeline_mode<synchronous>, transform_indices = @transform_3, window_bounds = array<i64: 1, 256>}, {pipeline_mode = #tpu.pipeline_mode<synchronous>, transform_indices = @transform_4, window_bounds = array<i64: 256, 128>}, {pipeline_mode = #tpu.pipeline_mode<synchronous>, transform_indices = @transform_5, window_bounds = array<i64: 1, 128>}, {pipeline_mode = #tpu.pipeline_mode<synchronous>, transform_indices = @transform_6, window_bounds = array<i64: 32, 256>}, {pipeline_mode = #tpu.pipeline_mode<synchronous>, transform_indices = @transform_7, window_bounds = array<i64: 1, 256>}, {pipeline_mode = #tpu.pipeline_mode<synchronous>, transform_indices = @transform_8, window_bounds = array<i64: 256, 768>}, {pipeline_mode = #tpu.pipeline_mode<synchronous>, transform_indices = @transform_9, window_bounds = array<i64: 1, 768>}, {transform_indices = @transform_10, window_bounds = array<i64: 8, 768>}, {transform_indices = @transform_11, window_bounds = array<i64: 8, 128>}]} {
    %c0 = arith.constant 0 : index
    %c0_0 = arith.constant 0 : index
    %0 = vector.load %arg1[%c0, %c0_0] : memref<8x768xf32, #tpu.memory_space<vmem>>, vector<8x768xf32>
    %1 = arith.truncf %0 : vector<8x768xf32> to vector<8x768xbf16>
    %c0_1 = arith.constant 0 : index
    %c0_2 = arith.constant 0 : index
    %2 = vector.load %arg3[%c0_1, %c0_2] : memref<768x256xbf16, #tpu.memory_space<vmem>>, vector<768x256xbf16>
    %cst = arith.constant dense<0.000000e+00> : vector<8x256xf32>
    %3 = tpu.matmul %1, %2, %cst {dimension_numbers = #tpu.dot_dimension_numbers<[1], [0], [0], [1], [0, 0, 1, 1], [], []>} : vector<8x768xbf16>, vector<768x256xbf16>, vector<8x256xf32> -> vector<8x256xf32>
    %c0_3 = arith.constant 0 : index
    %c0_4 = arith.constant 0 : index
    %4 = vector.load %arg4[%c0_3, %c0_4] : memref<1x256xf32, #tpu.memory_space<vmem>>, vector<1x256xf32>
    %5 = vector.broadcast %4 : vector<1x256xf32> to vector<8x256xf32>
    %6 = arith.addf %3, %5 : vector<8x256xf32>
    %cst_5 = arith.constant 0.000000e+00 : f32
    %7 = vector.broadcast %cst_5 : f32 to vector<8x256xf32>
    %8 = arith.maximumf %6, %7 : vector<8x256xf32>
    %9 = arith.truncf %8 : vector<8x256xf32> to vector<8x256xbf16>
    %c0_6 = arith.constant 0 : index
    %c0_7 = arith.constant 0 : index
    %10 = vector.load %arg5[%c0_6, %c0_7] : memref<256x128xbf16, #tpu.memory_space<vmem>>, vector<256x128xbf16>
    %cst_8 = arith.constant dense<0.000000e+00> : vector<8x128xf32>
    %11 = tpu.matmul %9, %10, %cst_8 {dimension_numbers = #tpu.dot_dimension_numbers<[1], [0], [0], [1], [0, 0, 1, 1], [], []>} : vector<8x256xbf16>, vector<256x128xbf16>, vector<8x128xf32> -> vector<8x128xf32>
    %c0_9 = arith.constant 0 : index
    %c0_10 = arith.constant 0 : index
    %12 = vector.load %arg6[%c0_9, %c0_10] : memref<1x128xf32, #tpu.memory_space<vmem>>, vector<1x128xf32>
    %13 = vector.broadcast %12 : vector<1x128xf32> to vector<8x128xf32>
    %14 = arith.addf %11, %13 : vector<8x128xf32>
    %15 = vector.extract_strided_slice %14 {offsets = [0, 0], sizes = [8, 32], strides = [1, 1]} : vector<8x128xf32> to vector<8x32xf32>
    %16 = vector.extract_strided_slice %14 {offsets = [0, 32], sizes = [8, 32], strides = [1, 1]} : vector<8x128xf32> to vector<8x32xf32>
    %c0_11 = arith.constant 0 : index
    %c0_12 = arith.constant 0 : index
    %17 = vector.load %arg2[%c0_11, %c0_12] : memref<8x32xf32, #tpu.memory_space<vmem>>, vector<8x32xf32>
    %cst_13 = arith.constant 5.000000e-01 : f32
    %18 = vector.broadcast %cst_13 : f32 to vector<8x32xf32>
    %19 = arith.mulf %18, %16 : vector<8x32xf32>
    %20 = math.exp %19 : vector<8x32xf32>
    %21 = arith.mulf %17, %20 : vector<8x32xf32>
    %22 = arith.addf %15, %21 : vector<8x32xf32>
    %23 = arith.truncf %22 : vector<8x32xf32> to vector<8x32xbf16>
    %c0_14 = arith.constant 0 : index
    %c0_15 = arith.constant 0 : index
    %24 = vector.load %arg7[%c0_14, %c0_15] : memref<32x256xbf16, #tpu.memory_space<vmem>>, vector<32x256xbf16>
    %cst_16 = arith.constant dense<0.000000e+00> : vector<8x256xf32>
    %25 = tpu.matmul %23, %24, %cst_16 {dimension_numbers = #tpu.dot_dimension_numbers<[1], [0], [0], [1], [0, 0, 1, 1], [], []>} : vector<8x32xbf16>, vector<32x256xbf16>, vector<8x256xf32> -> vector<8x256xf32>
    %c0_17 = arith.constant 0 : index
    %c0_18 = arith.constant 0 : index
    %26 = vector.load %arg8[%c0_17, %c0_18] : memref<1x256xf32, #tpu.memory_space<vmem>>, vector<1x256xf32>
    %27 = vector.broadcast %26 : vector<1x256xf32> to vector<8x256xf32>
    %28 = arith.addf %25, %27 : vector<8x256xf32>
    %cst_19 = arith.constant 0.000000e+00 : f32
    %29 = vector.broadcast %cst_19 : f32 to vector<8x256xf32>
    %30 = arith.maximumf %28, %29 : vector<8x256xf32>
    %31 = arith.truncf %30 : vector<8x256xf32> to vector<8x256xbf16>
    %c0_20 = arith.constant 0 : index
    %c0_21 = arith.constant 0 : index
    %32 = vector.load %arg9[%c0_20, %c0_21] : memref<256x768xbf16, #tpu.memory_space<vmem>>, vector<256x768xbf16>
    %cst_22 = arith.constant dense<0.000000e+00> : vector<8x768xf32>
    %33 = tpu.matmul %31, %32, %cst_22 {dimension_numbers = #tpu.dot_dimension_numbers<[1], [0], [0], [1], [0, 0, 1, 1], [], []>} : vector<8x256xbf16>, vector<256x768xbf16>, vector<8x768xf32> -> vector<8x768xf32>
    %c0_23 = arith.constant 0 : index
    %c0_24 = arith.constant 0 : index
    %34 = vector.load %arg10[%c0_23, %c0_24] : memref<1x768xf32, #tpu.memory_space<vmem>>, vector<1x768xf32>
    %35 = vector.broadcast %34 : vector<1x768xf32> to vector<8x768xf32>
    %36 = arith.addf %33, %35 : vector<8x768xf32>
    %37 = arith.negf %36 : vector<8x768xf32>
    %38 = math.exp %37 : vector<8x768xf32>
    %cst_25 = arith.constant 1.000000e+00 : f32
    %39 = vector.broadcast %cst_25 : f32 to vector<8x768xf32>
    %40 = arith.addf %39, %38 : vector<8x768xf32>
    %41 = arith.divf %39, %40 : vector<8x768xf32>
    %c0_26 = arith.constant 0 : index
    %c0_27 = arith.constant 0 : index
    %42 = vector.load %arg11[%c0_26, %c0_27] : memref<8x768xf32, #tpu.memory_space<vmem>>, vector<8x768xf32>
    tpu.vector_store %arg11[%c0_26, %c0_27], %41 {strides = array<i32>} : memref<8x768xf32, #tpu.memory_space<vmem>>, vector<8x768xf32>,
    %c0_28 = arith.constant 0 : index
    %c0_29 = arith.constant 0 : index
    %43 = vector.load %arg12[%c0_28, %c0_29] : memref<8x128xf32, #tpu.memory_space<vmem>>, vector<8x128xf32>
    tpu.vector_store %arg12[%c0_28, %c0_29], %14 {strides = array<i32>} : memref<8x128xf32, #tpu.memory_space<vmem>>, vector<8x128xf32>,
    return
  }
  func.func @transform_0(%arg0: i32) -> (i32, i32) {
    %c0_i32 = arith.constant 0 : i32
    %c0_i32_0 = arith.constant 0 : i32
    return %arg0, %c0_i32 : i32, i32
  }
  func.func @transform_1(%arg0: i32) -> (i32, i32) {
    %c0_i32 = arith.constant 0 : i32
    %c0_i32_0 = arith.constant 0 : i32
    return %arg0, %c0_i32 : i32, i32
  }
  func.func @transform_2(%arg0: i32) -> (i32, i32) {
    %c0_i32 = arith.constant 0 : i32
    %c0_i32_0 = arith.constant 0 : i32
    %c0_i32_1 = arith.constant 0 : i32
    return %c0_i32, %c0_i32_0 : i32, i32
  }
  func.func @transform_3(%arg0: i32) -> (i32, i32) {
    %c0_i32 = arith.constant 0 : i32
    %c0_i32_0 = arith.constant 0 : i32
    %c0_i32_1 = arith.constant 0 : i32
    return %c0_i32, %c0_i32_0 : i32, i32
  }
  func.func @transform_4(%arg0: i32) -> (i32, i32) {
    %c0_i32 = arith.constant 0 : i32
    %c0_i32_0 = arith.constant 0 : i32
    %c0_i32_1 = arith.constant 0 : i32
    return %c0_i32, %c0_i32_0 : i32, i32
  }
  func.func @transform_5(%arg0: i32) -> (i32, i32) {
    %c0_i32 = arith.constant 0 : i32
    %c0_i32_0 = arith.constant 0 : i32
    %c0_i32_1 = arith.constant 0 : i32
    return %c0_i32, %c0_i32_0 : i32, i32
  }
  func.func @transform_6(%arg0: i32) -> (i32, i32) {
    %c0_i32 = arith.constant 0 : i32
    %c0_i32_0 = arith.constant 0 : i32
    %c0_i32_1 = arith.constant 0 : i32
    return %c0_i32, %c0_i32_0 : i32, i32
  }
  func.func @transform_7(%arg0: i32) -> (i32, i32) {
    %c0_i32 = arith.constant 0 : i32
    %c0_i32_0 = arith.constant 0 : i32
    %c0_i32_1 = arith.constant 0 : i32
    return %c0_i32, %c0_i32_0 : i32, i32
  }
  func.func @transform_8(%arg0: i32) -> (i32, i32) {
    %c0_i32 = arith.constant 0 : i32
    %c0_i32_0 = arith.constant 0 : i32
    %c0_i32_1 = arith.constant 0 : i32
    return %c0_i32, %c0_i32_0 : i32, i32
  }
  func.func @transform_9(%arg0: i32) -> (i32, i32) {
    %c0_i32 = arith.constant 0 : i32
    %c0_i32_0 = arith.constant 0 : i32
    %c0_i32_1 = arith.constant 0 : i32
    return %c0_i32, %c0_i32_0 : i32, i32
  }
  func.func @transform_10(%arg0: i32) -> (i32, i32) {
    %c0_i32 = arith.constant 0 : i32
    %c0_i32_0 = arith.constant 0 : i32
    return %arg0, %c0_i32 : i32, i32
  }
  func.func @transform_11(%arg0: i32) -> (i32, i32) {
    %c0_i32 = arith.constant 0 : i32
    %c0_i32_0 = arith.constant 0 : i32
    return %arg0, %c0_i32 : i32, i32
  }
}

</mosaic_0001>

<bundles_post_ra>
// kernel: vae_forward.1
= control target key start
LH: loop header
LB: loop body
LE: loop exit
PB: predicated region body
PF: predicated region fallthrough
CT: control target
= control target key end

     0   :  { %17 = vsyncpa [#allocation3], 0  ;;  %s2901_s0 = inlined_call_operand.hbm [shape: f32[8,768], index: 0, kind: input, shape index: {}]   ;;  %s2902_s1 = inlined_call_operand.hbm [shape: f32[8,32], index: 1, kind: input, shape index: {}]   ;;  %s2903_s2 = inlined_call_operand.hbm [shape: bf16[768,256], index: 2, kind: input, shape index: {}]   ;;  %s2904_s3 = inlined_call_operand.vmem [shape: f32[1,256], index: 3, kind: input, shape index: {}]   ;;  %s2905_s4 = inlined_call_operand.hbm [shape: bf16[256,128], index: 4, kind: input, shape index: {}]   ;;  %s2906_s5 = inlined_call_operand.vmem [shape: f32[1,128], index: 5, kind: input, shape index: {}]   ;;  %s2907_s6 = inlined_call_operand.hbm [shape: bf16[32,256], index: 6, kind: input, shape index: {}]   ;;  %s2908_s7 = inlined_call_operand.vmem [shape: f32[1,256], index: 7, kind: input, shape index: {}]   ;;  %s2909_s8 = inlined_call_operand.hbm [shape: bf16[256,768], index: 8, kind: input, shape index: {}]   ;;  %s2910_s9 = inlined_call_operand.vmem [shape: f32[1,768], index: 9, kind: input, shape index: {}]   ;;  %s2911_s10 = inlined_call_operand.hbm [shape: f32[8,768], index: 10, kind: output, shape index: {0}]   ;;  %s2912_s11 = inlined_call_operand.vmem [shape: f32[8,128], index: 11, kind: output, shape index: {1}]  }
   0x1   :  { %18 = vsyncpa [#allocation6], 0 }
   0x2   :  { %19 = vsyncpa [#allocation9], 0 }
   0x3   :  { %20 = vsyncpa [#allocation12], 0 }
   0x4   :  { %21 = vsyncpa [#allocation4], 0  ;;  %s2678_s17 = smov [#allocation5]   ;;  %s2679_s19 = smov [#allocation8]  }
   0x5   :  { %s38_s18 = sshll.u32 %s2678_s17, 4  ;;  %s61_s20 = sshll.u32 %s2679_s19, 4  ;;  %s39_s18 = int_to_ptr.vmem [resolvable:$true] %s38_s18  ;;  %s2753_s20 = int_to_ptr.vmem [resolvable:$true] %s61_s20 }
   0x6   :  { %s2514_s23 = scalar_lea.hbm %s2902_s1, 128 }
   0x7   :  { %p2515_p0 = scmp.ne.s32.totalorder %s2902_s1, %s2514_s23  ;;  %p2518_p1 = scmp.lt.u32.totalorder %s2514_s23, %s2902_s1 }
   0x9   :  { %p2520_p2 = pnand %p2518_p1, %p2515_p0 }
   0xb   :  { %2523 = shalt.err (!%p2520_p2)
}
   0xc   :  { %s2524_s28 = scalar_lea.vmem %s39_s18, 128  ;;  %p2529_p4 = scmp.lt.s32.totalorder %s39_s18, %s39_s18 }
   0xd   :  { %p2525_p3 = scmp.ne.s32.totalorder %s39_s18, %s2524_s28  ;;  %p2530_p5 = scmp.lt.s32.totalorder %s2524_s28, %s2524_s28 }
   0xf   :  { %p2531_p6 = por %p2530_p5, %p2529_p4 }
  0x11   :  { %p2532_p7 = pnand %p2531_p6, %p2525_p3 }
  0x13   :  { %2535 = shalt.err (!%p2532_p7)
}
  0x14   :  { %41 = dma.hbm_to_vmem [thread:$0]  %s2902_s1, 128, %s39_s18, [#allocation6]  }
  0x15   :  { %s2536_s14 = scalar_lea.hbm %s2905_s4, 2048 }
  0x16   :  { %p2537_p8 = scmp.ne.s32.totalorder %s2905_s4, %s2536_s14  ;;  %p2540_p9 = scmp.lt.u32.totalorder %s2536_s14, %s2905_s4 }
  0x18   :  { %p2542_p10 = pnand %p2540_p9, %p2537_p8 }
  0x1a   :  { %2545 = shalt.err (!%p2542_p10)
}
  0x1b   :  { %s2546_s21 = scalar_lea.vmem %s2753_s20, 2048  ;;  %p2551_p12 = scmp.lt.s32.totalorder %s2753_s20, %s2753_s20 }
  0x1c   :  { %p2547_p11 = scmp.ne.s32.totalorder %s2753_s20, %s2546_s21  ;;  %p2552_p13 = scmp.lt.s32.totalorder %s2546_s21, %s2546_s21 }
  0x1e   :  { %p2553_p0 = por %p2552_p13, %p2551_p12 }
  0x20   :  { %p2554_p1 = pnand %p2553_p0, %p2547_p11 }
  0x22   :  { %2557 = shalt.err (!%p2554_p1)
}
  0x23   :  { %s2680_s1 = smov 64   ;;  %s2681_s18 = smov 4  }
  0x24   :  { %67 = dma.hbm_to_vmem [thread:$0]  %s2905_s4, 2048, %s2753_s20, [#allocation9], %s2680_s1, %s2680_s1, %s2681_s18  }
  0x25   :  { %s2682_s24 = smov [#allocation2]   ;;  %s2683_s26 = smov [#allocation7]  }
  0x26   :  { %s28_s25 = sshll.u32 %s2682_s24, 4  ;;  %s47_s27 = sshll.u32 %s2683_s26, 4  ;;  %s29_s25 = int_to_ptr.vmem [resolvable:$true] %s28_s25  ;;  %s2784_s27 = int_to_ptr.vmem [resolvable:$true] %s47_s27 }
  0x27   :  { %s2558_s30 = scalar_lea.hbm %s2901_s0, 768 }
  0x28   :  { %p2559_p2 = scmp.ne.s32.totalorder %s2901_s0, %s2558_s30  ;;  %p2562_p3 = scmp.lt.u32.totalorder %s2558_s30, %s2901_s0 }
  0x2a   :  { %p2564_p4 = pnand %p2562_p3, %p2559_p2 }
  0x2c   :  { %2567 = shalt.err (!%p2564_p4)
}
  0x2d   :  { %s2568_s4 = scalar_lea.vmem %s29_s25, 768  ;;  %p2573_p6 = scmp.lt.s32.totalorder %s29_s25, %s29_s25 }
  0x2e   :  { %p2569_p5 = scmp.ne.s32.totalorder %s29_s25, %s2568_s4  ;;  %p2574_p7 = scmp.lt.s32.totalorder %s2568_s4, %s2568_s4 }
  0x30   :  { %p2575_p8 = por %p2574_p7, %p2573_p6 }
  0x32   :  { %p2576_p9 = pnand %p2575_p8, %p2569_p5 }
  0x34   :  { %2579 = shalt.err (!%p2576_p9)
}
  0x35   :  { %31 = dma.hbm_to_vmem [thread:$0]  %s2901_s0, 768, %s29_s25, [#allocation3]  }
  0x36   :  { %s2580_s21 = scalar_lea.hbm %s2903_s2, 12288 }
  0x37   :  { %p2581_p10 = scmp.ne.s32.totalorder %s2903_s2, %s2580_s21  ;;  %p2584_p11 = scmp.lt.u32.totalorder %s2580_s21, %s2903_s2 }
  0x39   :  { %p2586_p12 = pnand %p2584_p11, %p2581_p10 }
  0x3b   :  { %2589 = shalt.err (!%p2586_p12)
}
  0x3c   :  { %s2590_s24 = scalar_lea.vmem %s2784_s27, 12288  ;;  %p2595_p0 = scmp.lt.s32.totalorder %s2784_s27, %s2784_s27 }
  0x3d   :  { %p2591_p13 = scmp.ne.s32.totalorder %s2784_s27, %s2590_s24  ;;  %p2596_p1 = scmp.lt.s32.totalorder %s2590_s24, %s2590_s24 }
  0x3f   :  { %p2597_p2 = por %p2596_p1, %p2595_p0 }
  0x41   :  { %p2598_p3 = pnand %p2597_p2, %p2591_p13 }
  0x43   :  { %2601 = shalt.err (!%p2598_p3)
}
  0x44   :  { %s2684_s0 = smov 128   ;;  %s2685_s25 = smov 8  }
  0x45   :  { %53 = dma.hbm_to_vmem [thread:$0]  %s2903_s2, 12288, %s2784_s27, [#allocation6], %s2684_s0, %s2684_s0, %s2685_s25  }
  0x46   :  { %s2686_s29 = smov [#allocation10]   ;;  %s2687_s12 = smov [#allocation11]  }
  0x47   :  { %s75_s30 = sshll.u32 %s2686_s29, 4  ;;  %s89_s13 = sshll.u32 %s2687_s12, 4  ;;  %s76_s30 = int_to_ptr.vmem [resolvable:$true] %s75_s30  ;;  %s2815_s13 = int_to_ptr.vmem [resolvable:$true] %s89_s13 }
  0x48   :  { %s2602_s4 = scalar_lea.hbm %s2907_s6, 512 }
  0x49   :  { %p2603_p4 = scmp.ne.s32.totalorder %s2907_s6, %s2602_s4  ;;  %p2606_p5 = scmp.lt.u32.totalorder %s2602_s4, %s2907_s6 }
  0x4b   :  { %p2608_p6 = pnand %p2606_p5, %p2603_p4 }
  0x4d   :  { %2611 = shalt.err (!%p2608_p6)
}
  0x4e   :  { %s2612_s2 = scalar_lea.vmem %s76_s30, 512  ;;  %p2617_p8 = scmp.lt.s32.totalorder %s76_s30, %s76_s30 }
  0x4f   :  { %p2613_p7 = scmp.ne.s32.totalorder %s76_s30, %s2612_s2  ;;  %p2618_p9 = scmp.lt.s32.totalorder %s2612_s2, %s2612_s2 }
  0x51   :  { %p2619_p10 = por %p2618_p9, %p2617_p8 }
  0x53   :  { %p2620_p11 = pnand %p2619_p10, %p2613_p7 }
  0x55   :  { %2623 = shalt.err (!%p2620_p11)
}
  0x56   :  { %81 = dma.hbm_to_vmem [thread:$0]  %s2907_s6, 512, %s76_s30, [#allocation9], %s2684_s0, %s2684_s0, %s2685_s25  }
  0x57   :  { %s2624_s22 = scalar_lea.hbm %s2909_s8, 12288 }
  0x58   :  { %p2625_p12 = scmp.ne.s32.totalorder %s2909_s8, %s2624_s22  ;;  %p2628_p13 = scmp.lt.u32.totalorder %s2624_s22, %s2909_s8 }
  0x5a   :  { %p2630_p0 = pnand %p2628_p13, %p2625_p12 }
  0x5c   :  { %2633 = shalt.err (!%p2630_p0)
}
  0x5d   :  { %s2634_s29 = scalar_lea.vmem %s2815_s13, 12288  ;;  %p2639_p2 = scmp.lt.s32.totalorder %s2815_s13, %s2815_s13 }
  0x5e   :  { %p2635_p1 = scmp.ne.s32.totalorder %s2815_s13, %s2634_s29  ;;  %p2640_p3 = scmp.lt.s32.totalorder %s2634_s29, %s2634_s29 }
  0x60   :  { %p2641_p4 = por %p2640_p3, %p2639_p2 }
  0x62   :  { %p2642_p5 = pnand %p2641_p4, %p2635_p1 }
  0x64   :  { %2645 = shalt.err (!%p2642_p5)
}
  0x65   :  { %s2688_s6 = smov 384   ;;  %s2689_s0 = smov 24  }
  0x66   :  { %95 = dma.hbm_to_vmem [thread:$0]  %s2909_s8, 12288, %s2815_s13, [#allocation12], %s2688_s6, %s2688_s6, %s2689_s0  }
  0x67   :  { %2668 = dma.done.wait [#allocation3], 768  }
  0x68   :  { %2669 = vsyncadd [#allocation3], 4294966528 }
  0x69   :  { %2670 = dma.done.wait [#allocation6], 12416  }
  0x6a   :  { %2671 = vsyncadd [#allocation6], 4294954880 }
  0x6b   :  { %2672 = dma.done.wait [#allocation9], 2560  }
  0x6c   :  { %2673 = vsyncadd [#allocation9], 4294964736 }
  0x6d   :  { %2674 = dma.done.wait [#allocation12], 12288  }
  0x6e   :  { %2675 = vsyncadd [#allocation12], 4294955008  ;;  %v2178_v0 = vld [vmem:[#allocation7 + $0x4] ss:$8 sps:$4 sm:$0xff]   ;;  %v2180_v1 = vld [vmem:[#allocation7] ss:$8 sps:$4 sm:$0xff]  }
  0x6f   :  { %717 = vmatprep.subr.bf16.mxu0 %v2178_v0  ;;  %v2181_v2 = vld [vmem:[#allocation7 + $0x14] ss:$8 sps:$4 sm:$0xff]   ;;  %v2183_v3 = vld [vmem:[#allocation7 + $0x10] ss:$8 sps:$4 sm:$0xff]   ;;  %v2184_v4 = vld [vmem:[#allocation7 + $0x24] ss:$8 sps:$4 sm:$0xff]  }
  0x70   :  { %718 = vmatpush1.bf16.msra.mxu0 %v2180_v1  ;;  %v2186_v5 = vld [vmem:[#allocation7 + $0x20] ss:$8 sps:$4 sm:$0xff]   ;;  %v2187_v6 = vld [vmem:[#allocation7 + $0x34] ss:$8 sps:$4 sm:$0xff]   ;;  %v2189_v7 = vld [vmem:[#allocation7 + $0x30] ss:$8 sps:$4 sm:$0xff]  }
  0x71   :  { %719 = vmatprep.subr.bf16.mxu0 %v2181_v2  ;;  %v2190_v8 = vld [vmem:[#allocation7 + $0x44] ss:$8 sps:$4 sm:$0xff]   ;;  %v2192_v9 = vld [vmem:[#allocation7 + $0x40] ss:$8 sps:$4 sm:$0xff]   ;;  %v2193_v10 = vld [vmem:[#allocation7 + $0x54] ss:$8 sps:$4 sm:$0xff]  }
  0x72   :  { %v2195_v11 = vld [vmem:[#allocation7 + $0x50] ss:$8 sps:$4 sm:$0xff]   ;;  %v2196_v12 = vld [vmem:[#allocation7 + $0x64] ss:$8 sps:$4 sm:$0xff]   ;;  %v2198_v15 = vld [vmem:[#allocation7 + $0x60] ss:$8 sps:$4 sm:$0xff]  }
  0x73   :  { %v118_v13 = vld [vmem:[#allocation2 + $0x8] sm:$0xff]  ;;  %v2202_v18 = vld [vmem:[#allocation7 + $0x84] ss:$8 sps:$4 sm:$0xff]   ;;  %v2204_v19 = vld [vmem:[#allocation7 + $0x80] ss:$8 sps:$4 sm:$0xff]   ;;  %vm1066_vm0 = vcmask 261120  }
  0x74   :  { %720 = vmatpush1.bf16.msra.mxu0 %v2183_v3  ;;  %v124_v14 = vpack.c.bf16 %v118_v13, %v118_v13  ;;  %v2199_v16 = vld [vmem:[#allocation7 + $0x74] ss:$8 sps:$4 sm:$0xff]   ;;  %v2201_v17 = vld [vmem:[#allocation7 + $0x70] ss:$8 sps:$4 sm:$0xff]   ;;  %v2208_v22 = vld [vmem:[#allocation7 + $0xa4] ss:$8 sps:$4 sm:$0xff]  }
  0x75   :  { %721 = vmatprep.subr.bf16.mxu0 %v2184_v4  ;;  %v2205_v20 = vld [vmem:[#allocation7 + $0x94] ss:$8 sps:$4 sm:$0xff]   ;;  %v2207_v21 = vld [vmem:[#allocation7 + $0x90] ss:$8 sps:$4 sm:$0xff]   ;;  %v2210_v23 = vld [vmem:[#allocation7 + $0xa0] ss:$8 sps:$4 sm:$0xff]  }
  0x76   :  { %749 = vmatprep.mubr.bf16.mxu0 %v124_v14  ;;  %v2211_v24 = vld [vmem:[#allocation7 + $0xb4] ss:$8 sps:$4 sm:$0xff]   ;;  %v2213_v25 = vld [vmem:[#allocation7 + $0xb0] ss:$8 sps:$4 sm:$0xff]   ;;  %v2214_v26 = vld [vmem:[#allocation7 + $0xc4] ss:$8 sps:$4 sm:$0xff]  }
  0x77   :  { %v2216_v27 = vld [vmem:[#allocation7 + $0xc0] ss:$8 sps:$4 sm:$0xff]   ;;  %v2217_v28 = vld [vmem:[#allocation7 + $0xd4] ss:$8 sps:$4 sm:$0xff]   ;;  %v2219_v29 = vld [vmem:[#allocation7 + $0xd0] ss:$8 sps:$4 sm:$0xff]  }
  0x78   :  { %722 = vmatpush1.bf16.msra.mxu0 %v2186_v5  ;;  %v2220_v30 = vld [vmem:[#allocation7 + $0xe4] ss:$8 sps:$4 sm:$0xff]   ;;  %v2222_v31 = vld [vmem:[#allocation7 + $0xe0] ss:$8 sps:$4 sm:$0xff]   ;;  %v2223_v32 = vld [vmem:[#allocation7 + $0xf4] ss:$8 sps:$4 sm:$0xff]  }
  0x79   :  { %723 = vmatprep.subr.bf16.mxu0 %v2187_v6  ;;  %v2225_v33 = vld [vmem:[#allocation7 + $0xf0] ss:$8 sps:$4 sm:$0xff]   ;;  %v2228_v34 = vld [vmem:[#allocation7 + $0x104] ss:$8 sps:$4 sm:$0xff]   ;;  %v2226_v38 = vld [vmem:[#allocation7 + $0x100] ss:$8 sps:$4 sm:$0xff]  }
  0x7a   :  { %v117_v35 = vld [vmem:[#allocation2] sm:$0xff]  ;;  %v120_v36 = vld [vmem:[#allocation2 + $0x18] sm:$0xff]  ;;  %v2231_v40 = vld [vmem:[#allocation7 + $0x114] ss:$8 sps:$4 sm:$0xff]  }
  0x7b   :  { %v123_v37 = vpack.c.bf16 %v117_v35, %v117_v35  ;;  %v126_v39 = vpack.c.bf16 %v120_v36, %v120_v36  ;;  %v2229_v41 = vld [vmem:[#allocation7 + $0x110] ss:$8 sps:$4 sm:$0xff]   ;;  %v2234_v42 = vld [vmem:[#allocation7 + $0x124] ss:$8 sps:$4 sm:$0xff]   ;;  %v2232_v43 = vld [vmem:[#allocation7 + $0x120] ss:$8 sps:$4 sm:$0xff]  }
  0x7c   :  { %724 = vmatpush1.bf16.msra.mxu0 %v2189_v7  ;;  %v2237_v44 = vld [vmem:[#allocation7 + $0x134] ss:$8 sps:$4 sm:$0xff]   ;;  %v2235_v45 = vld [vmem:[#allocation7 + $0x130] ss:$8 sps:$4 sm:$0xff]   ;;  %v2240_v46 = vld [vmem:[#allocation7 + $0x144] ss:$8 sps:$4 sm:$0xff]  }
  0x7d   :  { %725 = vmatprep.subr.bf16.mxu0 %v2190_v8  ;;  %v2238_v47 = vld [vmem:[#allocation7 + $0x140] ss:$8 sps:$4 sm:$0xff]   ;;  %v2243_v48 = vld [vmem:[#allocation7 + $0x154] ss:$8 sps:$4 sm:$0xff]   ;;  %v2241_v49 = vld [vmem:[#allocation7 + $0x150] ss:$8 sps:$4 sm:$0xff]  }
  0x7e   :  { %v2246_v50 = vld [vmem:[#allocation7 + $0x164] ss:$8 sps:$4 sm:$0xff]   ;;  %v2244_v51 = vld [vmem:[#allocation7 + $0x160] ss:$8 sps:$4 sm:$0xff]   ;;  %v2249_v52 = vld [vmem:[#allocation7 + $0x174] ss:$8 sps:$4 sm:$0xff]  }
  0x7f   :  { %v2247_v53 = vld [vmem:[#allocation7 + $0x170] ss:$8 sps:$4 sm:$0xff]   ;;  %v2252_v54 = vld [vmem:[#allocation7 + $0x184] ss:$8 sps:$4 sm:$0xff]   ;;  %v2250_v55 = vld [vmem:[#allocation7 + $0x180] ss:$8 sps:$4 sm:$0xff]  }
  0x80   :  { %726 = vmatpush1.bf16.msra.mxu0 %v2192_v9  ;;  %v2255_v56 = vld [vmem:[#allocation7 + $0x194] ss:$8 sps:$4 sm:$0xff]   ;;  %v2253_v57 = vld [vmem:[#allocation7 + $0x190] ss:$8 sps:$4 sm:$0xff]   ;;  %v2258_v58 = vld [vmem:[#allocation7 + $0x1a4] ss:$8 sps:$4 sm:$0xff]  }
  0x81   :  { %727 = vmatprep.subr.bf16.mxu0 %v2193_v10  ;;  %v2256_v59 = vld [vmem:[#allocation7 + $0x1a0] ss:$8 sps:$4 sm:$0xff]   ;;  %v2261_v60 = vld [vmem:[#allocation7 + $0x1b4] ss:$8 sps:$4 sm:$0xff]   ;;  %v2259_v61 = vld [vmem:[#allocation7 + $0x1b0] ss:$8 sps:$4 sm:$0xff]  }
  0x82   :  { %v2264_v62 = vld [vmem:[#allocation7 + $0x1c4] ss:$8 sps:$4 sm:$0xff]   ;;  %v2262_v63 = vld [vmem:[#allocation7 + $0x1c0] ss:$8 sps:$4 sm:$0xff]   ;;  %v2267_v0 = vld [vmem:[#allocation7 + $0x1d4] ss:$8 sps:$4 sm:$0xff]  }
  0x83   :  { %v2265_v1 = vld [vmem:[#allocation7 + $0x1d0] ss:$8 sps:$4 sm:$0xff]   ;;  %v2270_v2 = vld [vmem:[#allocation7 + $0x1e4] ss:$8 sps:$4 sm:$0xff]   ;;  %v2268_v3 = vld [vmem:[#allocation7 + $0x1e0] ss:$8 sps:$4 sm:$0xff]  }
  0x84   :  { %728 = vmatpush1.bf16.msra.mxu0 %v2195_v11  ;;  %v2273_v4 = vld [vmem:[#allocation7 + $0x1f4] ss:$8 sps:$4 sm:$0xff]   ;;  %v2271_v5 = vld [vmem:[#allocation7 + $0x1f0] ss:$8 sps:$4 sm:$0xff]   ;;  %v2276_v7 = vld [vmem:[#allocation7 + $0x204] ss:$8 sps:$4 sm:$0xff]  }
  0x85   :  { %729 = vmatprep.subr.bf16.mxu0 %v2196_v12  ;;  %v119_v6 = vld [vmem:[#allocation2 + $0x10] sm:$0xff]  ;;  %v122_v8 = vld [vmem:[#allocation2 + $0x28] sm:$0xff]  ;;  %v2274_v10 = vld [vmem:[#allocation7 + $0x200] ss:$8 sps:$4 sm:$0xff]  }
  0x86   :  { %v125_v9 = vpack.c.bf16 %v119_v6, %v119_v6  ;;  %v128_v11 = vpack.c.bf16 %v122_v8, %v122_v8  ;;  %v2279_v12 = vld [vmem:[#allocation7 + $0x214] ss:$8 sps:$4 sm:$0xff]   ;;  %v2277_v13 = vld [vmem:[#allocation7 + $0x210] ss:$8 sps:$4 sm:$0xff]   ;;  %v2282_v14 = vld [vmem:[#allocation7 + $0x224] ss:$8 sps:$4 sm:$0xff]  }
  0x87   :  { %v2310_v35 = vld [vmem:[#allocation7 + $0x2c0] ss:$8 sps:$4 sm:$0xff]   ;;  %v2315_v36 = vld [vmem:[#allocation7 + $0x2d4] ss:$8 sps:$4 sm:$0xff]  }
  0x88   :  { %730 = vmatpush1.bf16.msra.mxu0 %v2198_v15  ;;  %v2280_v15 = vld [vmem:[#allocation7 + $0x220] ss:$8 sps:$4 sm:$0xff]  }
  0x89   :  { %731 = vmatprep.subr.bf16.mxu0 %v2199_v16  ;;  %v2285_v16 = vld [vmem:[#allocation7 + $0x234] ss:$8 sps:$4 sm:$0xff]  }
  0x8c   :  { %732 = vmatpush1.bf16.msra.mxu0 %v2201_v17  ;;  %v2283_v17 = vld [vmem:[#allocation7 + $0x230] ss:$8 sps:$4 sm:$0xff]  }
  0x8d   :  { %733 = vmatprep.subr.bf16.mxu0 %v2202_v18  ;;  %v2288_v18 = vld [vmem:[#allocation7 + $0x244] ss:$8 sps:$4 sm:$0xff]  }
  0x90   :  { %734 = vmatpush1.bf16.msra.mxu0 %v2204_v19  ;;  %v2286_v19 = vld [vmem:[#allocation7 + $0x240] ss:$8 sps:$4 sm:$0xff]  }
  0x91   :  { %735 = vmatprep.subr.bf16.mxu0 %v2205_v20  ;;  %v2291_v20 = vld [vmem:[#allocation7 + $0x254] ss:$8 sps:$4 sm:$0xff]  }
  0x94   :  { %736 = vmatpush1.bf16.msra.mxu0 %v2207_v21  ;;  %v2289_v21 = vld [vmem:[#allocation7 + $0x250] ss:$8 sps:$4 sm:$0xff]  }
  0x95   :  { %737 = vmatprep.subr.bf16.mxu0 %v2208_v22  ;;  %v2294_v22 = vld [vmem:[#allocation7 + $0x264] ss:$8 sps:$4 sm:$0xff]  }
  0x98   :  { %738 = vmatpush1.bf16.msra.mxu0 %v2210_v23  ;;  %v2292_v23 = vld [vmem:[#allocation7 + $0x260] ss:$8 sps:$4 sm:$0xff]  }
  0x99   :  { %739 = vmatprep.subr.bf16.mxu0 %v2211_v24  ;;  %v2297_v24 = vld [vmem:[#allocation7 + $0x274] ss:$8 sps:$4 sm:$0xff]  }
  0x9c   :  { %740 = vmatpush1.bf16.msra.mxu0 %v2213_v25  ;;  %v2295_v25 = vld [vmem:[#allocation7 + $0x270] ss:$8 sps:$4 sm:$0xff]  }
  0x9d   :  { %741 = vmatprep.subr.bf16.mxu0 %v2214_v26  ;;  %v2300_v26 = vld [vmem:[#allocation7 + $0x284] ss:$8 sps:$4 sm:$0xff]  }
  0xa0   :  { %742 = vmatpush1.bf16.msra.mxu0 %v2216_v27  ;;  %v2298_v27 = vld [vmem:[#allocation7 + $0x280] ss:$8 sps:$4 sm:$0xff]  }
  0xa1   :  { %743 = vmatprep.subr.bf16.mxu0 %v2217_v28  ;;  %v2303_v28 = vld [vmem:[#allocation7 + $0x294] ss:$8 sps:$4 sm:$0xff]  }
  0xa4   :  { %744 = vmatpush1.bf16.msra.mxu0 %v2219_v29  ;;  %v2301_v29 = vld [vmem:[#allocation7 + $0x290] ss:$8 sps:$4 sm:$0xff]  }
  0xa5   :  { %745 = vmatprep.subr.bf16.mxu0 %v2220_v30  ;;  %v2306_v30 = vld [vmem:[#allocation7 + $0x2a4] ss:$8 sps:$4 sm:$0xff]  }
  0xa8   :  { %746 = vmatpush1.bf16.msra.mxu0 %v2222_v31  ;;  %v2304_v31 = vld [vmem:[#allocation7 + $0x2a0] ss:$8 sps:$4 sm:$0xff]  }
  0xa9   :  { %747 = vmatprep.subr.bf16.mxu0 %v2223_v32  ;;  %v2309_v32 = vld [vmem:[#allocation7 + $0x2b4] ss:$8 sps:$4 sm:$0xff]  }
  0xac   :  { %748 = vmatpush1.bf16.msra.mxu0 %v2225_v33  ;;  %v2307_v33 = vld [vmem:[#allocation7 + $0x2b0] ss:$8 sps:$4 sm:$0xff]  }
  0xad   :  { %758 = vmatprep.subr.bf16.mxu0 %v2228_v34  ;;  %v2312_v34 = vld [vmem:[#allocation7 + $0x2c4] ss:$8 sps:$4 sm:$0xff]  }
  0xaf   :  { %750 = vmatmul.mubr.bf16.vlgmr.msra.gmra.mrb[0].mxu0 %v123_v37  ;;  %v2313_v37 = vld [vmem:[#allocation7 + $0x2d0] ss:$8 sps:$4 sm:$0xff]  }
  0xb0   :  { %759 = vmatpush1.bf16.msra.mxu0 %v2226_v38  ;;  %790 = vmatprep.mubr.bf16.mxu0 %v126_v39  ;;  %v2318_v38 = vld [vmem:[#allocation7 + $0x2e4] ss:$8 sps:$4 sm:$0xff]   ;;  %v2316_v39 = vld [vmem:[#allocation7 + $0x2e0] ss:$8 sps:$4 sm:$0xff]  }
  0xb1   :  { %760 = vmatprep.subr.bf16.mxu0 %v2231_v40  ;;  %v2321_v40 = vld [vmem:[#allocation7 + $0x2f4] ss:$8 sps:$4 sm:$0xff]  }
  0xb4   :  { %761 = vmatpush1.bf16.msra.mxu0 %v2229_v41  ;;  %v2319_v41 = vld [vmem:[#allocation7 + $0x2f0] ss:$8 sps:$4 sm:$0xff]  }
  0xb5   :  { %762 = vmatprep.subr.bf16.mxu0 %v2234_v42  ;;  %v121_v42 = vld [vmem:[#allocation2 + $0x20] sm:$0xff] }
  0xb8   :  { %763 = vmatpush1.bf16.msra.mxu0 %v2232_v43  ;;  %v2322_v43 = vld [vmem:[#allocation8 + $0x40] sm:$0xff]  }
  0xb9   :  { %764 = vmatprep.subr.bf16.mxu0 %v2237_v44  ;;  %v127_v44 = vpack.c.bf16 %v121_v42, %v121_v42  ;;  %v2356_v42 = vld [vmem:[#allocation11 + $0xc0] ss:$24 sps:$4 sm:$0xff]  }
  0xbc   :  { %765 = vmatpush1.bf16.msra.mxu0 %v2235_v45  ;;  %v2323_v45 = vld [vmem:[#allocation8] sm:$0xff]  }
  0xbd   :  { %766 = vmatprep.subr.bf16.mxu0 %v2240_v46  ;;  %v2324_v46 = vld [vmem:[#allocation8 + $0x48] sm:$0xff]  }
  0xc0   :  { %767 = vmatpush1.bf16.msra.mxu0 %v2238_v47  ;;  %v2325_v47 = vld [vmem:[#allocation8 + $0x8] sm:$0xff]  }
  0xc1   :  { %768 = vmatprep.subr.bf16.mxu0 %v2243_v48  ;;  %v2326_v48 = vld [vmem:[#allocation8 + $0x50] sm:$0xff]  }
  0xc4   :  { %769 = vmatpush1.bf16.msra.mxu0 %v2241_v49  ;;  %v2327_v49 = vld [vmem:[#allocation8 + $0x10] sm:$0xff]  }
  0xc5   :  { %770 = vmatprep.subr.bf16.mxu0 %v2246_v50  ;;  %v2328_v50 = vld [vmem:[#allocation8 + $0x58] sm:$0xff]  }
  0xc8   :  { %771 = vmatpush1.bf16.msra.mxu0 %v2244_v51  ;;  %v2329_v51 = vld [vmem:[#allocation8 + $0x18] sm:$0xff]  }
  0xc9   :  { %772 = vmatprep.subr.bf16.mxu0 %v2249_v52  ;;  %v2330_v52 = vld [vmem:[#allocation8 + $0x60] sm:$0xff]  }
  0xcc   :  { %773 = vmatpush1.bf16.msra.mxu0 %v2247_v53  ;;  %v2331_v53 = vld [vmem:[#allocation8 + $0x20] sm:$0xff]  }
  0xcd   :  { %774 = vmatprep.subr.bf16.mxu0 %v2252_v54  ;;  %v2332_v54 = vld [vmem:[#allocation8 + $0x68] sm:$0xff]  }
  0xd0   :  { %775 = vmatpush1.bf16.msra.mxu0 %v2250_v55  ;;  %v2333_v55 = vld [vmem:[#allocation8 + $0x28] sm:$0xff]  }
  0xd1   :  { %776 = vmatprep.subr.bf16.mxu0 %v2255_v56  ;;  %v2334_v56 = vld [vmem:[#allocation8 + $0x70] sm:$0xff]  }
  0xd4   :  { %777 = vmatpush1.bf16.msra.mxu0 %v2253_v57  ;;  %v2335_v57 = vld [vmem:[#allocation8 + $0x30] sm:$0xff]  }
  0xd5   :  { %778 = vmatprep.subr.bf16.mxu0 %v2258_v58  ;;  %v2336_v58 = vld [vmem:[#allocation8 + $0x78] sm:$0xff]  }
  0xd8   :  { %779 = vmatpush1.bf16.msra.mxu0 %v2256_v59  ;;  %v2337_v59 = vld [vmem:[#allocation8 + $0x38] sm:$0xff]  }
  0xd9   :  { %780 = vmatprep.subr.bf16.mxu0 %v2261_v60  ;;  %v227_v60 = vlaneseq }
  0xdc   :  { %781 = vmatpush1.bf16.msra.mxu0 %v2259_v61  ;;  %v2846_v61 = vshrl.u32 %v227_v60, 7  ;;  %v2383_v60 = vld [vmem:[#allocation11 + $0x270] ss:$24 sps:$4 sm:$0xff]  }
  0xdd   :  { %782 = vmatprep.subr.bf16.mxu0 %v2264_v62 }
  0xde   :  { %v2849_v62 = vsub.s32 0, %v2846_v61 }
  0xe0   :  { %783 = vmatpush1.bf16.msra.mxu0 %v2262_v63  ;;  %v225_v63 = vld [vmem:[%s2904_s3] sm:$0x3] }
  0xe1   :  { %784 = vmatprep.subr.bf16.mxu0 %v2267_v0  ;;  %v2855_v0 = vsub.s32 1, %v2846_v61 }
  0xe4   :  { %785 = vmatpush1.bf16.msra.mxu0 %v2265_v1  ;;  %v230_v1 = vrot.slane %v225_v63, %v2849_v62 }
  0xe5   :  { %786 = vmatprep.subr.bf16.mxu0 %v2270_v2  ;;  %v234_v2 = vrot.slane %v225_v63, %v2855_v0  ;;  %v2388_v63 = vld [vmem:[#allocation11 + $0x2a4] ss:$24 sps:$4 sm:$0xff]  }
  0xe8   :  { %787 = vmatpush1.bf16.msra.mxu0 %v2268_v3 }
  0xe9   :  { %788 = vmatprep.subr.bf16.mxu0 %v2273_v4 }
  0xec   :  { %789 = vmatpush1.bf16.msra.mxu0 %v2271_v5 }
  0xed   :  { %799 = vmatprep.subr.bf16.mxu0 %v2276_v7 }
  0xef   :  { %791 = vmatmul.mubr.bf16.vlgmr.msra.gmra.mrb[0].mxu0 %v125_v9 }
  0xf0   :  { %800 = vmatpush1.bf16.msra.mxu0 %v2274_v10  ;;  %831 = vmatprep.mubr.bf16.mxu0 %v128_v11 }
  0xf1   :  { %801 = vmatprep.subr.bf16.mxu0 %v2279_v12 }
  0xf4   :  { %802 = vmatpush1.bf16.msra.mxu0 %v2277_v13  ;;  %v2338_v13 = vld [vmem:[#allocation10 + $0x4] ss:$8 sps:$4 sm:$0xff]  }
  0xf5   :  { %803 = vmatprep.subr.bf16.mxu0 %v2282_v14  ;;  %1070 = vmatprep.subr.bf16.mxu1 %v2338_v13 }
  0xf8   :  { %804 = vmatpush1.bf16.msra.mxu0 %v2280_v15  ;;  %v2007_v15 = vld [vmem:[%s2906_s5] ss:$0 sm:$0xff]  ;;  %s2691_s5 = smov 96  }
  0xf9   :  { %805 = vmatprep.subr.bf16.mxu0 %v2285_v16 }
  0xfc   :  { %806 = vmatpush1.bf16.msra.mxu0 %v2283_v17 }
  0xfd   :  { %807 = vmatprep.subr.bf16.mxu0 %v2288_v18 }
 0x100   :  { %808 = vmatpush1.bf16.msra.mxu0 %v2286_v19 }
 0x101   :  { %809 = vmatprep.subr.bf16.mxu0 %v2291_v20 }
 0x104   :  { %810 = vmatpush1.bf16.msra.mxu0 %v2289_v21  ;;  %v2340_v21 = vld [vmem:[#allocation10] ss:$8 sps:$4 sm:$0xff]  }
 0x105   :  { %811 = vmatprep.subr.bf16.mxu0 %v2294_v22  ;;  %1071 = vmatpush1.bf16.msra.mxu1 %v2340_v21  ;;  %v2400_v21 = vld [vmem:[#allocation11 + $0x6c] ss:$24 sps:$4 sm:$0xff]  }
 0x108   :  { %812 = vmatpush1.bf16.msra.mxu0 %v2292_v23 }
 0x109   :  { %813 = vmatprep.subr.bf16.mxu0 %v2297_v24  ;;  %v2341_v24 = vld [vmem:[#allocation10 + $0x14] ss:$8 sps:$4 sm:$0xff]  }
 0x10a   :  { %1072 = vmatprep.subr.bf16.mxu1 %v2341_v24  ;;  %v2401_v24 = vld [vmem:[#allocation11 + $0x98] ss:$24 sps:$4 sm:$0xff]  }
 0x10c   :  { %814 = vmatpush1.bf16.msra.mxu0 %v2295_v25  ;;  %v2343_v25 = vld [vmem:[#allocation10 + $0x10] ss:$8 sps:$4 sm:$0xff]  }
 0x10d   :  { %815 = vmatprep.subr.bf16.mxu0 %v2300_v26  ;;  %1073 = vmatpush1.bf16.msra.mxu1 %v2343_v25  ;;  %v2690_v26 = vmov 0   ;;  %v2406_v25 = vld [vmem:[#allocation11 + $0xcc] ss:$24 sps:$4 sm:$0xff]  }
 0x10e   :  { %1102 = vmatprep.mubr.bf16.mxu1 %v2690_v26  ;;  %v2404_v26 = vld [vmem:[#allocation11 + $0xc8] ss:$24 sps:$4 sm:$0xff]  }
 0x110   :  { %816 = vmatpush1.bf16.msra.mxu0 %v2298_v27  ;;  %v2346_v27 = vld [vmem:[#allocation11 + $0x4] ss:$24 sps:$4 sm:$0xff]  }
 0x111   :  { %817 = vmatprep.subr.bf16.mxu0 %v2303_v28  ;;  %1723 = vmatprep.subr.bf16.mxu1 %v2346_v27  ;;  %v2409_v27 = vld [vmem:[#allocation11 + $0xfc] ss:$24 sps:$4 sm:$0xff]  }
 0x114   :  { %818 = vmatpush1.bf16.msra.mxu0 %v2301_v29  ;;  %v1019_v29 = vld [vmem:[#allocation5] sm:$0xff] }
 0x115   :  { %819 = vmatprep.subr.bf16.mxu0 %v2306_v30 }
 0x118   :  { %820 = vmatpush1.bf16.msra.mxu0 %v2304_v31 }
 0x119   :  { %821 = vmatprep.subr.bf16.mxu0 %v2309_v32 }
 0x11c   :  { %822 = vmatpush1.bf16.msra.mxu0 %v2307_v33  ;;  %v2344_v33 = vld [vmem:[#allocation11] ss:$24 sps:$4 sm:$0xff]  }
 0x11d   :  { %823 = vmatprep.subr.bf16.mxu0 %v2312_v34 }
 0x120   :  { %824 = vmatpush1.bf16.msra.mxu0 %v2310_v35  ;;  %v2349_v35 = vld [vmem:[#allocation11 + $0x34] ss:$24 sps:$4 sm:$0xff]  }
 0x121   :  { %825 = vmatprep.subr.bf16.mxu0 %v2315_v36  ;;  %v2347_v36 = vld [vmem:[#allocation11 + $0x30] ss:$24 sps:$4 sm:$0xff]  }
 0x124   :  { %826 = vmatpush1.bf16.msra.mxu0 %v2313_v37  ;;  %v2352_v37 = vld [vmem:[#allocation11 + $0x64] ss:$24 sps:$4 sm:$0xff]  }
 0x125   :  { %827 = vmatprep.subr.bf16.mxu0 %v2318_v38  ;;  %v2350_v38 = vld [vmem:[#allocation11 + $0x60] ss:$24 sps:$4 sm:$0xff]  }
 0x128   :  { %828 = vmatpush1.bf16.msra.mxu0 %v2316_v39  ;;  %v2355_v39 = vld [vmem:[#allocation11 + $0x94] ss:$24 sps:$4 sm:$0xff]  }
 0x129   :  { %829 = vmatprep.subr.bf16.mxu0 %v2321_v40  ;;  %v2353_v40 = vld [vmem:[#allocation11 + $0x90] ss:$24 sps:$4 sm:$0xff]  }
 0x12c   :  { %830 = vmatpush1.bf16.msra.mxu0 %v2319_v41  ;;  %v2358_v41 = vld [vmem:[#allocation11 + $0xc4] ss:$24 sps:$4 sm:$0xff]  }
 0x12d   :  { %2131 = vmatprep.subr.bf16.mxu0 %v2322_v43  ;;  %v2361_v43 = vld [vmem:[#allocation11 + $0xf4] ss:$24 sps:$4 sm:$0xff]  }
 0x12f   :  { %832 = vmatmul.mubr.bf16.vlgmr.msra.gmra.mrb[0].mxu0 %v127_v44  ;;  %v2359_v44 = vld [vmem:[#allocation11 + $0xf0] ss:$24 sps:$4 sm:$0xff]  }
 0x130   :  { %2132 = vmatpush3.bf16.msra.mxu0 %v2323_v45  ;;  %v2364_v45 = vld [vmem:[#allocation11 + $0x124] ss:$24 sps:$4 sm:$0xff]  }
 0x131   :  { %2133 = vmatprep.subr.bf16.mxu0 %v2324_v46  ;;  %v2362_v46 = vld [vmem:[#allocation11 + $0x120] ss:$24 sps:$4 sm:$0xff]  }
 0x134   :  { %2134 = vmatpush3.bf16.msra.mxu0 %v2325_v47  ;;  %v2367_v47 = vld [vmem:[#allocation11 + $0x154] ss:$24 sps:$4 sm:$0xff]  }
 0x135   :  { %2135 = vmatprep.subr.bf16.mxu0 %v2326_v48  ;;  %v2365_v48 = vld [vmem:[#allocation11 + $0x150] ss:$24 sps:$4 sm:$0xff]  }
 0x138   :  { %2136 = vmatpush3.bf16.msra.mxu0 %v2327_v49  ;;  %v2370_v49 = vld [vmem:[#allocation11 + $0x184] ss:$24 sps:$4 sm:$0xff]  }
 0x139   :  { %2137 = vmatprep.subr.bf16.mxu0 %v2328_v50  ;;  %v2368_v50 = vld [vmem:[#allocation11 + $0x180] ss:$24 sps:$4 sm:$0xff]  }
 0x13c   :  { %2138 = vmatpush3.bf16.msra.mxu0 %v2329_v51  ;;  %v2373_v51 = vld [vmem:[#allocation11 + $0x1b4] ss:$24 sps:$4 sm:$0xff]  }
 0x13d   :  { %2139 = vmatprep.subr.bf16.mxu0 %v2330_v52  ;;  %v2371_v52 = vld [vmem:[#allocation11 + $0x1b0] ss:$24 sps:$4 sm:$0xff]  }
 0x140   :  { %2140 = vmatpush3.bf16.msra.mxu0 %v2331_v53  ;;  %v2376_v53 = vld [vmem:[#allocation11 + $0x1e4] ss:$24 sps:$4 sm:$0xff]  }
 0x141   :  { %2141 = vmatprep.subr.bf16.mxu0 %v2332_v54  ;;  %v2374_v54 = vld [vmem:[#allocation11 + $0x1e0] ss:$24 sps:$4 sm:$0xff]  }
 0x144   :  { %2142 = vmatpush3.bf16.msra.mxu0 %v2333_v55  ;;  %v2379_v55 = vld [vmem:[#allocation11 + $0x214] ss:$24 sps:$4 sm:$0xff]  }
 0x145   :  { %2143 = vmatprep.subr.bf16.mxu0 %v2334_v56  ;;  %v2377_v56 = vld [vmem:[#allocation11 + $0x210] ss:$24 sps:$4 sm:$0xff]  }
 0x148   :  { %2144 = vmatpush3.bf16.msra.mxu0 %v2335_v57  ;;  %v2382_v57 = vld [vmem:[#allocation11 + $0x244] ss:$24 sps:$4 sm:$0xff]  }
 0x149   :  { %2145 = vmatprep.subr.bf16.mxu0 %v2336_v58  ;;  %v2380_v58 = vld [vmem:[#allocation11 + $0x240] ss:$24 sps:$4 sm:$0xff]  }
 0x14c   :  { %2146 = vmatpush3.bf16.msra.mxu0 %v2337_v59  ;;  %v2385_v59 = vld [vmem:[#allocation11 + $0x274] ss:$24 sps:$4 sm:$0xff]  }
 0x202   :  { %v833_v3 = vpop.f32.mrb[0].mxu0 }
 0x203   :  { %v2153_v4 = vadd.f32 %v833_v3, %v230_v1  ;;  %v835_v5 = vpop.f32.mrb[1].mxu0  ;;  %v2386_v1 = vld [vmem:[#allocation11 + $0x2a0] ss:$24 sps:$4 sm:$0xff]   ;;  %v2389_v3 = vld [vmem:[#allocation11 + $0x2d0] ss:$24 sps:$4 sm:$0xff]  }
 0x204   :  { %v2154_v6 = vadd.f32 %v835_v5, %v234_v2  ;;  %v837_v7 = vpop.f32.mrb[2].mxu0  ;;  %v2391_v2 = vld [vmem:[#allocation11 + $0x2d4] ss:$24 sps:$4 sm:$0xff]   ;;  %v1034_v5 = vld [vmem:[%s2908_s7] sm:$0x3] }
 0x205   :  { %v840_v8 = vmax.f32 %v2153_v4, 0.0  ;;  %v838_v9 = vpop.f32.mrb[3].mxu0  ;;  %v2394_v4 = vld [vmem:[#allocation11 + $0xc] ss:$24 sps:$4 sm:$0xff]   ;;  %v1043_v7 = vrot.slane %v1034_v5, %v2855_v0 }
 0x206   :  { %v841_v10 = vmax.f32 %v2154_v6, 0.0  ;;  %v1039_v6 = vrot.slane %v1034_v5, %v2849_v62  ;;  %v2464_v5 = vld [vmem:[#allocation11 + $0x190] ss:$24 sps:$4 sm:$0xff]  }
 0x207   :  { %v842_v12 = vpack.c.bf16 %v840_v8, %v840_v8 }
 0x208   :  { %v843_v11 = vpack.c.bf16 %v841_v10, %v841_v10 }
 0x20a   :  { %1011 = vmatprep.mubr.bf16.mxu0 %v843_v11 }
 0x20b   :  { %1012 = vmatmul.mubr.bf16.vlgmr.msra.gmra.mrb[4].mxu0 %v842_v12 }
 0x2de   :  { %v2147_v14 = vpop.f32.mrb[4].mxu0 }
 0x2df   :  { %v2148_v16 = vpop.f32.mrb[5].mxu0 }
 0x2e0   :  { %v2149_v17 = vadd.f32 %v2148_v16, %v2147_v14  ;;  %v2150_v18 = vpop.f32.mrb[6].mxu0 }
 0x2e1   :  { %v2151_v19 = vpop.f32.mrb[7].mxu0 }
 0x2e2   :  { %v1014_v20 = vadd.f32 %v2149_v17, %v2007_v15  ;;  %v2392_v17 = vld [vmem:[#allocation11 + $0x8] ss:$24 sps:$4 sm:$0xff]   ;;  %v2397_v19 = vld [vmem:[#allocation11 + $0x3c] ss:$24 sps:$4 sm:$0xff]  }
 0x2e4   :  { %v1020_v22 = vmul.f32 0.5, %v1014_v20  ;;  %1888 = vst [vmem:[%s2912_s11] sm:$0xff] %v1014_v20 }
 0x2e6   :  { %v1021_v23 = vmul.f32 1.442695, %v1020_v22  ;;  %v2398_v22 = vld [vmem:[#allocation11 + $0x68] ss:$24 sps:$4 sm:$0xff]  }
 0x2e8   :  { %2488 = vpow2.f32 %v1021_v23  ;;  %v2403_v23 = vld [vmem:[#allocation11 + $0x9c] ss:$24 sps:$4 sm:$0xff]  }
 0x2f2   :  { %v2489_v28 = vpop.eup %2488 }
 0x2f3   :  { %1024 = vrot.lane.b32.xlu0 %v2489_v28, %s2691_s5  ;;  %v2407_v28 = vld [vmem:[#allocation11 + $0xf8] ss:$24 sps:$4 sm:$0xff]  }
 0x365   :  { %v1025_v30 = vpop.permute.xlu0 %1024 }
 0x366   :  { %v1027_v31 = vmul.f32 %v1025_v30, %v1019_v29  ;;  %v2412_v29 = vld [vmem:[#allocation11 + $0x12c] ss:$24 sps:$4 sm:$0xff]   ;;  %v2410_v30 = vld [vmem:[#allocation11 + $0x128] ss:$24 sps:$4 sm:$0xff]  }
 0x368   :  { %v1028_v32 = vadd.f32 %v1027_v31, %v1014_v20  ;;  %v2395_v20 = vld [vmem:[#allocation11 + $0x38] ss:$24 sps:$4 sm:$0xff]   ;;  %v2415_v31 = vld [vmem:[#allocation11 + $0x15c] ss:$24 sps:$4 sm:$0xff]  }
 0x36a   :  { %v1029_v34 = vpack.c.bf16 %v1028_v32, %v1028_v32  ;;  %v2413_v32 = vld [vmem:[#allocation11 + $0x158] ss:$24 sps:$4 sm:$0xff]  }
 0x36c   :  { %2028 = vmatmul.mubr.msk.bf16.vlgmr.msra.gmra.mrb[0].mxu1 %vm1066_vm0, %v1029_v34  ;;  %v2416_v34 = vld [vmem:[#allocation11 + $0x188] ss:$24 sps:$4 sm:$0xff]  }
 0x36d   :  { %1724 = vmatpush1.bf16.msra.mxu1 %v2344_v33  ;;  %v2418_v33 = vld [vmem:[#allocation11 + $0x18c] ss:$24 sps:$4 sm:$0xff]  }
 0x36e   :  { %1725 = vmatprep.subr.bf16.mxu1 %v2349_v35  ;;  %v2421_v35 = vld [vmem:[#allocation11 + $0x1bc] ss:$24 sps:$4 sm:$0xff]  }
 0x371   :  { %1726 = vmatpush1.bf16.msra.mxu1 %v2347_v36  ;;  %v2419_v36 = vld [vmem:[#allocation11 + $0x1b8] ss:$24 sps:$4 sm:$0xff]  }
 0x372   :  { %1727 = vmatprep.subr.bf16.mxu1 %v2352_v37  ;;  %v2424_v37 = vld [vmem:[#allocation11 + $0x1ec] ss:$24 sps:$4 sm:$0xff]  }
 0x375   :  { %1728 = vmatpush1.bf16.msra.mxu1 %v2350_v38  ;;  %v2422_v38 = vld [vmem:[#allocation11 + $0x1e8] ss:$24 sps:$4 sm:$0xff]  }
 0x376   :  { %1729 = vmatprep.subr.bf16.mxu1 %v2355_v39  ;;  %v2427_v39 = vld [vmem:[#allocation11 + $0x21c] ss:$24 sps:$4 sm:$0xff]  }
 0x379   :  { %1730 = vmatpush1.bf16.msra.mxu1 %v2353_v40  ;;  %v2425_v40 = vld [vmem:[#allocation11 + $0x218] ss:$24 sps:$4 sm:$0xff]  }
 0x37a   :  { %1731 = vmatprep.subr.bf16.mxu1 %v2358_v41  ;;  %v2430_v41 = vld [vmem:[#allocation11 + $0x24c] ss:$24 sps:$4 sm:$0xff]  }
 0x37d   :  { %1732 = vmatpush1.bf16.msra.mxu1 %v2356_v42  ;;  %v2428_v42 = vld [vmem:[#allocation11 + $0x248] ss:$24 sps:$4 sm:$0xff]  }
 0x37e   :  { %1733 = vmatprep.subr.bf16.mxu1 %v2361_v43  ;;  %v2433_v43 = vld [vmem:[#allocation11 + $0x27c] ss:$24 sps:$4 sm:$0xff]  }
 0x381   :  { %1734 = vmatpush1.bf16.msra.mxu1 %v2359_v44  ;;  %v2431_v44 = vld [vmem:[#allocation11 + $0x278] ss:$24 sps:$4 sm:$0xff]  }
 0x382   :  { %1735 = vmatprep.subr.bf16.mxu1 %v2364_v45  ;;  %v2436_v45 = vld [vmem:[#allocation11 + $0x2ac] ss:$24 sps:$4 sm:$0xff]  }
 0x385   :  { %1736 = vmatpush1.bf16.msra.mxu1 %v2362_v46  ;;  %v2434_v46 = vld [vmem:[#allocation11 + $0x2a8] ss:$24 sps:$4 sm:$0xff]  }
 0x386   :  { %1737 = vmatprep.subr.bf16.mxu1 %v2367_v47  ;;  %v2439_v47 = vld [vmem:[#allocation11 + $0x2dc] ss:$24 sps:$4 sm:$0xff]  }
 0x389   :  { %1738 = vmatpush1.bf16.msra.mxu1 %v2365_v48  ;;  %v2437_v48 = vld [vmem:[#allocation11 + $0x2d8] ss:$24 sps:$4 sm:$0xff]  }
 0x38a   :  { %1739 = vmatprep.subr.bf16.mxu1 %v2370_v49  ;;  %v2442_v49 = vld [vmem:[#allocation11 + $0x14] ss:$24 sps:$4 sm:$0xff]  }
 0x38d   :  { %1740 = vmatpush1.bf16.msra.mxu1 %v2368_v50  ;;  %v2440_v50 = vld [vmem:[#allocation11 + $0x10] ss:$24 sps:$4 sm:$0xff]  }
 0x38e   :  { %1741 = vmatprep.subr.bf16.mxu1 %v2373_v51  ;;  %v2445_v51 = vld [vmem:[#allocation11 + $0x44] ss:$24 sps:$4 sm:$0xff]  }
 0x391   :  { %1742 = vmatpush1.bf16.msra.mxu1 %v2371_v52  ;;  %v2443_v52 = vld [vmem:[#allocation11 + $0x40] ss:$24 sps:$4 sm:$0xff]  }
 0x392   :  { %1743 = vmatprep.subr.bf16.mxu1 %v2376_v53  ;;  %v2448_v53 = vld [vmem:[#allocation11 + $0x74] ss:$24 sps:$4 sm:$0xff]  }
 0x395   :  { %1744 = vmatpush1.bf16.msra.mxu1 %v2374_v54  ;;  %v2446_v54 = vld [vmem:[#allocation11 + $0x70] ss:$24 sps:$4 sm:$0xff]  }
 0x396   :  { %1745 = vmatprep.subr.bf16.mxu1 %v2379_v55  ;;  %v2451_v55 = vld [vmem:[#allocation11 + $0xa4] ss:$24 sps:$4 sm:$0xff]  }
 0x399   :  { %1746 = vmatpush1.bf16.msra.mxu1 %v2377_v56  ;;  %v2449_v56 = vld [vmem:[#allocation11 + $0xa0] ss:$24 sps:$4 sm:$0xff]  }
 0x39a   :  { %1747 = vmatprep.subr.bf16.mxu1 %v2382_v57  ;;  %v2454_v57 = vld [vmem:[#allocation11 + $0xd4] ss:$24 sps:$4 sm:$0xff]  }
 0x39d   :  { %1748 = vmatpush1.bf16.msra.mxu1 %v2380_v58  ;;  %v2452_v58 = vld [vmem:[#allocation11 + $0xd0] ss:$24 sps:$4 sm:$0xff]  }
 0x39e   :  { %1749 = vmatprep.subr.bf16.mxu1 %v2385_v59  ;;  %v2457_v59 = vld [vmem:[#allocation11 + $0x104] ss:$24 sps:$4 sm:$0xff]  }
 0x3a1   :  { %1750 = vmatpush1.bf16.msra.mxu1 %v2383_v60  ;;  %v2455_v60 = vld [vmem:[#allocation11 + $0x100] ss:$24 sps:$4 sm:$0xff]  }
 0x3a2   :  { %1751 = vmatprep.subr.bf16.mxu1 %v2388_v63  ;;  %v2460_v63 = vld [vmem:[#allocation11 + $0x134] ss:$24 sps:$4 sm:$0xff]  }
 0x3a5   :  { %1752 = vmatpush1.bf16.msra.mxu1 %v2386_v1  ;;  %v2458_v1 = vld [vmem:[#allocation11 + $0x130] ss:$24 sps:$4 sm:$0xff]  }
 0x3a6   :  { %1753 = vmatprep.subr.bf16.mxu1 %v2391_v2  ;;  %v2463_v2 = vld [vmem:[#allocation11 + $0x164] ss:$24 sps:$4 sm:$0xff]  }
 0x3a9   :  { %1754 = vmatpush1.bf16.msra.mxu1 %v2389_v3  ;;  %v2461_v3 = vld [vmem:[#allocation11 + $0x160] ss:$24 sps:$4 sm:$0xff]  }
 0x3aa   :  { %1764 = vmatprep.subr.bf16.mxu1 %v2394_v4  ;;  %v2466_v4 = vld [vmem:[#allocation11 + $0x194] ss:$24 sps:$4 sm:$0xff]  }
 0x43f   :  { %v1104_v8 = vpop.f32.mrb[0].mxu1 }
 0x440   :  { %v1105_v9 = vadd.f32 %v1104_v8, %v1039_v6  ;;  %v1106_v10 = vpop.f32.mrb[1].mxu1  ;;  %v2469_v6 = vld [vmem:[#allocation11 + $0x1c4] ss:$24 sps:$4 sm:$0xff]   ;;  %v2472_v8 = vld [vmem:[#allocation11 + $0x1f4] ss:$24 sps:$4 sm:$0xff]  }
 0x441   :  { %v1107_v11 = vadd.f32 %v1106_v10, %v1043_v7  ;;  %v1108_v12 = vpop.f32.mrb[2].mxu1  ;;  %v2467_v7 = vld [vmem:[#allocation11 + $0x1c0] ss:$24 sps:$4 sm:$0xff]   ;;  %v2475_v10 = vld [vmem:[#allocation11 + $0x224] ss:$24 sps:$4 sm:$0xff]  }
 0x442   :  { %v1111_v13 = vmax.f32 %v1105_v9, 0.0  ;;  %v1109_v14 = vpop.f32.mrb[3].mxu1  ;;  %v2470_v9 = vld [vmem:[#allocation11 + $0x1f0] ss:$24 sps:$4 sm:$0xff]   ;;  %v2478_v12 = vld [vmem:[#allocation11 + $0x254] ss:$24 sps:$4 sm:$0xff]  }
 0x443   :  { %v1112_v15 = vmax.f32 %v1107_v11, 0.0  ;;  %v2473_v11 = vld [vmem:[#allocation11 + $0x220] ss:$24 sps:$4 sm:$0xff]   ;;  %v2481_v14 = vld [vmem:[#allocation11 + $0x284] ss:$24 sps:$4 sm:$0xff]  }
 0x444   :  { %v2872_v18 = vpack.c.bf16 %v1111_v13, %v1111_v13  ;;  %v2476_v13 = vld [vmem:[#allocation11 + $0x250] ss:$24 sps:$4 sm:$0xff]  }
 0x445   :  { %v2870_v16 = vpack.c.bf16 %v1112_v15, %v1112_v15  ;;  %v2479_v15 = vld [vmem:[#allocation11 + $0x280] ss:$24 sps:$4 sm:$0xff]  }
 0x447   :  { %1755 = vmatprep.mubr.bf16.mxu1 %v2870_v16 }
 0x448   :  { %1756 = vmatmul.mubr.bf16.vlgmr.msra.gmra.mrb[4].mxu1 %v2872_v18 }
 0x449   :  { %1765 = vmatpush1.bf16.msra.mxu1 %v2392_v17  ;;  %1796 = vmatprep.mubr.bf16.mxu1 %v2870_v16  ;;  %v2482_v17 = vld [vmem:[#allocation11 + $0x2b0] ss:$24 sps:$4 sm:$0xff]  }
 0x44a   :  { %1766 = vmatprep.subr.bf16.mxu1 %v2397_v19  ;;  %v2487_v19 = vld [vmem:[#allocation11 + $0x2e4] ss:$24 sps:$4 sm:$0xff]  }
 0x44d   :  { %1767 = vmatpush1.bf16.msra.mxu1 %v2395_v20  ;;  %v2485_v20 = vld [vmem:[#allocation11 + $0x2e0] ss:$24 sps:$4 sm:$0xff]  }
 0x44e   :  { %1768 = vmatprep.subr.bf16.mxu1 %v2400_v21  ;;  %v1211_v21 = vld [vmem:[%s2910_s9] sm:$0x3f]  ;;  %s2692_s9 = smov [#allocation13]  }
 0x44f   :  { %s1895_s16 = sshll.u32 %s2692_s9, 4  ;;  %s1896_s16 = int_to_ptr.vmem [resolvable:$true] %s1895_s16 }
 0x450   :  { %s2646_s17 = scalar_lea.vmem %s1896_s16, 768  ;;  %p2651_p7 = scmp.lt.s32.totalorder %s1896_s16, %s1896_s16 }
 0x451   :  { %1769 = vmatpush1.bf16.msra.mxu1 %v2398_v22  ;;  %v1216_v22 = vrot.slane %v1211_v21, %v2849_v62  ;;  %p2647_p6 = scmp.ne.s32.totalorder %s1896_s16, %s2646_s17  ;;  %p2652_p8 = scmp.lt.s32.totalorder %s2646_s17, %s2646_s17 }
 0x452   :  { %1770 = vmatprep.subr.bf16.mxu1 %v2403_v23  ;;  %v1220_v23 = vrot.slane %v1211_v21, %v2855_v0  ;;  %v1223_v0 = vsub.s32 2, %v2846_v61 }
 0x453   :  { %p2653_p9 = por %p2652_p8, %p2651_p7 }
 0x455   :  { %1771 = vmatpush1.bf16.msra.mxu1 %v2401_v24  ;;  %p2654_p10 = pnand %p2653_p9, %p2647_p6 }
 0x456   :  { %1772 = vmatprep.subr.bf16.mxu1 %v2406_v25 }
 0x459   :  { %1773 = vmatpush1.bf16.msra.mxu1 %v2404_v26 }
 0x45a   :  { %1774 = vmatprep.subr.bf16.mxu1 %v2409_v27 }
 0x45d   :  { %1775 = vmatpush1.bf16.msra.mxu1 %v2407_v28 }
 0x45e   :  { %1776 = vmatprep.subr.bf16.mxu1 %v2412_v29 }
 0x461   :  { %1777 = vmatpush1.bf16.msra.mxu1 %v2410_v30 }
 0x462   :  { %1778 = vmatprep.subr.bf16.mxu1 %v2415_v31 }
 0x465   :  { %1779 = vmatpush1.bf16.msra.mxu1 %v2413_v32 }
 0x466   :  { %1780 = vmatprep.subr.bf16.mxu1 %v2418_v33 }
 0x469   :  { %1781 = vmatpush1.bf16.msra.mxu1 %v2416_v34 }
 0x46a   :  { %1782 = vmatprep.subr.bf16.mxu1 %v2421_v35 }
 0x46d   :  { %1783 = vmatpush1.bf16.msra.mxu1 %v2419_v36  ;;  %v1227_v36 = vsub.s32 3, %v2846_v61 }
 0x46e   :  { %1784 = vmatprep.subr.bf16.mxu1 %v2424_v37  ;;  %v1224_v37 = vrot.slane %v1211_v21, %v1223_v0 }
 0x471   :  { %1785 = vmatpush1.bf16.msra.mxu1 %v2422_v38  ;;  %v1228_v38 = vrot.slane %v1211_v21, %v1227_v36 }
 0x472   :  { %1786 = vmatprep.subr.bf16.mxu1 %v2427_v39 }
 0x475   :  { %1787 = vmatpush1.bf16.msra.mxu1 %v2425_v40 }
 0x476   :  { %1788 = vmatprep.subr.bf16.mxu1 %v2430_v41 }
 0x479   :  { %1789 = vmatpush1.bf16.msra.mxu1 %v2428_v42 }
 0x47a   :  { %1790 = vmatprep.subr.bf16.mxu1 %v2433_v43 }
 0x47d   :  { %1791 = vmatpush1.bf16.msra.mxu1 %v2431_v44 }
 0x47e   :  { %1792 = vmatprep.subr.bf16.mxu1 %v2436_v45 }
 0x481   :  { %1793 = vmatpush1.bf16.msra.mxu1 %v2434_v46 }
 0x482   :  { %1794 = vmatprep.subr.bf16.mxu1 %v2439_v47 }
 0x485   :  { %1795 = vmatpush1.bf16.msra.mxu1 %v2437_v48 }
 0x486   :  { %1805 = vmatprep.subr.bf16.mxu1 %v2442_v49 }
 0x488   :  { %1797 = vmatmul.mubr.bf16.vlgmr.msra.gmra.mrb[8].mxu1 %v2872_v18 }
 0x489   :  { %1806 = vmatpush1.bf16.msra.mxu1 %v2440_v50  ;;  %1837 = vmatprep.mubr.bf16.mxu1 %v2870_v16  ;;  %v2484_v16 = vld [vmem:[#allocation11 + $0x2b4] ss:$24 sps:$4 sm:$0xff]  }
 0x48a   :  { %1807 = vmatprep.subr.bf16.mxu1 %v2445_v51 }
 0x48d   :  { %1808 = vmatpush1.bf16.msra.mxu1 %v2443_v52 }
 0x48e   :  { %1809 = vmatprep.subr.bf16.mxu1 %v2448_v53  ;;  %v1231_v53 = vsub.s32 4, %v2846_v61 }
 0x491   :  { %1810 = vmatpush1.bf16.msra.mxu1 %v2446_v54  ;;  %v1235_v54 = vsub.s32 5, %v2846_v61 }
 0x492   :  { %1811 = vmatprep.subr.bf16.mxu1 %v2451_v55  ;;  %v1232_v55 = vrot.slane %v1211_v21, %v1231_v53 }
 0x495   :  { %1812 = vmatpush1.bf16.msra.mxu1 %v2449_v56  ;;  %v1236_v56 = vrot.slane %v1211_v21, %v1235_v54 }
 0x496   :  { %1813 = vmatprep.subr.bf16.mxu1 %v2454_v57 }
 0x499   :  { %1814 = vmatpush1.bf16.msra.mxu1 %v2452_v58 }
 0x49a   :  { %1815 = vmatprep.subr.bf16.mxu1 %v2457_v59 }
 0x49d   :  { %1816 = vmatpush1.bf16.msra.mxu1 %v2455_v60 }
 0x49e   :  { %1817 = vmatprep.subr.bf16.mxu1 %v2460_v63 }
 0x4a1   :  { %1818 = vmatpush1.bf16.msra.mxu1 %v2458_v1 }
 0x4a2   :  { %1819 = vmatprep.subr.bf16.mxu1 %v2463_v2 }
 0x4a5   :  { %1820 = vmatpush1.bf16.msra.mxu1 %v2461_v3 }
 0x4a6   :  { %1821 = vmatprep.subr.bf16.mxu1 %v2466_v4 }
 0x4a9   :  { %1822 = vmatpush1.bf16.msra.mxu1 %v2464_v5 }
 0x4aa   :  { %1823 = vmatprep.subr.bf16.mxu1 %v2469_v6 }
 0x4ad   :  { %1824 = vmatpush1.bf16.msra.mxu1 %v2467_v7 }
 0x4ae   :  { %1825 = vmatprep.subr.bf16.mxu1 %v2472_v8 }
 0x4b1   :  { %1826 = vmatpush1.bf16.msra.mxu1 %v2470_v9 }
 0x4b2   :  { %1827 = vmatprep.subr.bf16.mxu1 %v2475_v10 }
 0x4b5   :  { %1828 = vmatpush1.bf16.msra.mxu1 %v2473_v11 }
 0x4b6   :  { %1829 = vmatprep.subr.bf16.mxu1 %v2478_v12 }
 0x4b9   :  { %1830 = vmatpush1.bf16.msra.mxu1 %v2476_v13 }
 0x4ba   :  { %1831 = vmatprep.subr.bf16.mxu1 %v2481_v14 }
 0x4bd   :  { %1832 = vmatpush1.bf16.msra.mxu1 %v2479_v15 }
 0x4be   :  { %1833 = vmatprep.subr.bf16.mxu1 %v2484_v16 }
 0x4c1   :  { %1834 = vmatpush1.bf16.msra.mxu1 %v2482_v17 }
 0x4c2   :  { %1835 = vmatprep.subr.bf16.mxu1 %v2487_v19 }
 0x4c5   :  { %1836 = vmatpush1.bf16.msra.mxu1 %v2485_v20 }
 0x4c8   :  { %1838 = vmatmul.mubr.bf16.vlgmr.msra.gmra.mrb[12].mxu1 %v2872_v18 }
 0x51b   :  { %v1757_v24 = vpop.f32.mrb[4].mxu1 }
 0x51c   :  { %v1758_v25 = vadd.f32 %v1757_v24, %v1216_v22  ;;  %v1759_v26 = vpop.f32.mrb[5].mxu1 }
 0x51d   :  { %v1760_v27 = vadd.f32 %v1759_v26, %v1220_v23  ;;  %v1761_v28 = vpop.f32.mrb[6].mxu1 }
 0x51e   :  { %v2125_v29 = vmul.f32 -1.442695, %v1758_v25  ;;  %v1762_v30 = vpop.f32.mrb[7].mxu1 }
 0x51f   :  { %v2126_v31 = vmul.f32 -1.442695, %v1760_v27 }
 0x520   :  { %2490 = vpow2.f32 %v2125_v29 }
 0x521   :  { %2492 = vpow2.f32 %v2126_v31 }
 0x52a   :  { %v2491_v32 = vpop.eup %2490 }
 0x52b   :  { %v2493_v18 = vpop.eup %2492  ;;  %v1864_v33 = vadd.f32 1.0, %v2491_v32 }
 0x52c   :  { %v1865_v34 = vadd.f32 1.0, %v2493_v18 }
 0x52d   :  { %2494 = vrcp.f32 %v1864_v33 }
 0x52e   :  { %2496 = vrcp.f32 %v1865_v34 }
 0x537   :  { %v2495_v35 = vpop.eup %2494 }
 0x538   :  { %v2497_v62 = vpop.eup %2496  ;;  %1882 = vst [vmem:[#allocation13] sm:$0xff] %v2495_v35 }
 0x539   :  { %1883 = vst [vmem:[#allocation13 + $0x8] sm:$0xff] %v2497_v62 }
 0x55b   :  { %v1798_v39 = vpop.f32.mrb[8].mxu1 }
 0x55c   :  { %v1799_v40 = vadd.f32 %v1798_v39, %v1224_v37  ;;  %v1800_v41 = vpop.f32.mrb[9].mxu1 }
 0x55d   :  { %v1801_v42 = vadd.f32 %v1800_v41, %v1228_v38  ;;  %v1802_v43 = vpop.f32.mrb[10].mxu1 }
 0x55e   :  { %v2127_v44 = vmul.f32 -1.442695, %v1799_v40  ;;  %v1803_v45 = vpop.f32.mrb[11].mxu1 }
 0x55f   :  { %v2128_v46 = vmul.f32 -1.442695, %v1801_v42 }
 0x560   :  { %2498 = vpow2.f32 %v2127_v44 }
 0x561   :  { %2500 = vpow2.f32 %v2128_v46 }
 0x56a   :  { %v2499_v47 = vpop.eup %2498 }
 0x56b   :  { %v2501_v48 = vpop.eup %2500  ;;  %v1866_v49 = vadd.f32 1.0, %v2499_v47 }
 0x56c   :  { %v1867_v50 = vadd.f32 1.0, %v2501_v48 }
 0x56d   :  { %2502 = vrcp.f32 %v1866_v49 }
 0x56e   :  { %2504 = vrcp.f32 %v1867_v50 }
 0x577   :  { %v2503_v51 = vpop.eup %2502 }
 0x578   :  { %v2505_v52 = vpop.eup %2504  ;;  %1884 = vst [vmem:[#allocation13 + $0x10] sm:$0xff] %v2503_v51 }
 0x579   :  { %1885 = vst [vmem:[#allocation13 + $0x18] sm:$0xff] %v2505_v52 }
 0x59b   :  { %v1839_v57 = vpop.f32.mrb[12].mxu1 }
 0x59c   :  { %v1840_v58 = vadd.f32 %v1839_v57, %v1232_v55  ;;  %v1841_v59 = vpop.f32.mrb[13].mxu1 }
 0x59d   :  { %v1842_v60 = vadd.f32 %v1841_v59, %v1236_v56  ;;  %v1843_v63 = vpop.f32.mrb[14].mxu1 }
 0x59e   :  { %v2129_v1 = vmul.f32 -1.442695, %v1840_v58  ;;  %v1844_v2 = vpop.f32.mrb[15].mxu1 }
 0x59f   :  { %v2130_v3 = vmul.f32 -1.442695, %v1842_v60 }
 0x5a0   :  { %2506 = vpow2.f32 %v2129_v1 }
 0x5a1   :  { %2508 = vpow2.f32 %v2130_v3 }
 0x5aa   :  { %v2507_v4 = vpop.eup %2506 }
 0x5ab   :  { %v2509_v5 = vpop.eup %2508  ;;  %v1868_v6 = vadd.f32 1.0, %v2507_v4 }
 0x5ac   :  { %v1869_v7 = vadd.f32 1.0, %v2509_v5 }
 0x5ad   :  { %2510 = vrcp.f32 %v1868_v6 }
 0x5ae   :  { %2512 = vrcp.f32 %v1869_v7 }
 0x5b7   :  { %v2511_v61 = vpop.eup %2510 }
 0x5b8   :  { %v2513_v8 = vpop.eup %2512  ;;  %1886 = vst [vmem:[#allocation13 + $0x20] sm:$0xff] %v2511_v61 }
 0x5b9   :  { %1887 = vst [vmem:[#allocation13 + $0x28] sm:$0xff] %v2513_v8 }
 0x5ba   :  { %2657 = shalt.err (!%p2654_p10)
}
 0x5bb   :  { %s2658_s27 = scalar_lea.hbm %s2911_s10, 768 }
 0x5bc   :  { %p2659_p11 = scmp.ne.s32.totalorder %s2911_s10, %s2658_s27  ;;  %p2662_p12 = scmp.lt.u32.totalorder %s2658_s27, %s2911_s10 }
 0x5be   :  { %p2664_p13 = pnand %p2662_p12, %p2659_p11 }
 0x5c0   :  { %2667 = shalt.err (!%p2664_p13)
}
 0x5c1   :  { %1898 = dma.vmem_to_hbm [thread:$0]  %s1896_s16, 768, %s2911_s10, [#allocation4]  }
 0x5c2   :  { %2676 = dma.done.wait [#allocation4], 768  }
 0x5c3   :  { %2677 = vsyncadd [#allocation4], 4294966528 }
 0x5c4   :  { %1906 = vsyncpa [#allocation3], 1 }
 0x5c5   :  { %1907 = vsyncpa [#allocation6], 1 }
 0x5c6   :  { %1908 = vsyncpa [#allocation9], 1 }
 0x5c7   :  { %1909 = vsyncpa [#allocation12], 1 }
 0x5c8   :  { %1910 = vsyncpa [#allocation4], 1 }

</bundles_post_ra>
